<compile_context>
chip_gen: v6e
topology: v6e:2x2x1
jax: 0.10.0
libtpu: 0.0.40
codegen_flags: <defaults>
</compile_context>

<pallas_src>
import math

import jax
import jax.numpy as jnp
from jax.experimental import pallas as pl
from jax.experimental.pallas import tpu as pltpu

# Logical (PyTorch) dims.
D_IN = 400
D_H = 1000
D_Z = 20

# Padded, MXU/lane-friendly hidden dims (multiples of 128).  The 400-wide
# input/output dims stay at their logical size (full-dim blocks).
P_H = 1024
P_Z = 128


def _round_up(n, m):
    return ((n + m - 1) // m) * m


def ae_kernel(x_ref, w1_ref, b1_ref, w2_ref, b2_ref,
              w3_ref, b3_ref, w4_ref, b4_ref, out_ref):
    # Cast the streamed f32 activation tile to bf16 in-kernel (MXU-native),
    # accumulate in f32; bias/ReLU/sigmoid run in f32.
    x = x_ref[...].astype(jnp.bfloat16)
    h1 = jnp.dot(x, w1_ref[...], preferred_element_type=jnp.float32)
    h1 = jnp.maximum(h1 + b1_ref[...], 0.0)
    z = jnp.dot(h1.astype(jnp.bfloat16), w2_ref[...],
                preferred_element_type=jnp.float32)
    z = jnp.maximum(z + b2_ref[...], 0.0)
    h3 = jnp.dot(z.astype(jnp.bfloat16), w3_ref[...],
                 preferred_element_type=jnp.float32)
    h3 = jnp.maximum(h3 + b3_ref[...], 0.0)
    logits = jnp.dot(h3.astype(jnp.bfloat16), w4_ref[...],
                     preferred_element_type=jnp.float32)
    logits = logits + b4_ref[...]
    out_ref[...] = jax.nn.sigmoid(logits).astype(out_ref.dtype)


def prepare_params(params):
    """Zero-pad hidden dims (1000->1024, 20->128), cast weights to bf16.

    The 400-wide input rows of w1 / output cols of w4 (and b4) are NOT padded
    so the streamed x / out tiles stay at logical width.  Zero padding of the
    hidden lanes is numerically transparent: padded lanes get zero weights and
    zero biases, relu(0)=0 propagates zeros into the next layer's zero rows.
    """
    (w1, b1), (w2, b2), (w3, b3), (w4, b4) = params

    def pad_w(w, rows, cols):
        out = jnp.zeros((rows, cols), jnp.float32)
        out = out.at[: w.shape[0], : w.shape[1]].set(w)
        return out.astype(jnp.bfloat16)

    def pad_b(b, cols):
        out = jnp.zeros((1, cols), jnp.float32)
        return out.at[:, : b.shape[1]].set(b)

    return (
        pad_w(w1, D_IN, P_H), pad_b(b1, P_H),   # fc1: 400 -> 1024(1000)
        pad_w(w2, P_H, P_Z), pad_b(b2, P_Z),    # fc2: 1024 -> 128(20)
        pad_w(w3, P_Z, P_H), pad_b(b3, P_H),    # fc3: 128 -> 1024(1000)
        pad_w(w4, P_H, D_IN), pad_b(b4, D_IN),  # fc4: 1024 -> 400
    )


def ae_forward(x, prepared_params, *, block_m=512, out_dtype=jnp.bfloat16):
    """x: any shape whose total size is a multiple of 400 (e.g. NCHW)."""
    x2d = x.reshape(-1, D_IN).astype(jnp.float32)
    B = x2d.shape[0]

    # Batch tile: large (512) so per-grid-step overhead is amortized and M
    # tiles the 256-tall MXU exactly on v6e/v7x; shrunk to a sublane multiple
    # for tiny batches.
    tm = min(block_m, _round_up(B, 8))
    # v7x: guarantee >= 2 grid steps when the batch allows it, so the
    # "parallel" batch axis shards across both TensorCores.
    if tm > 8 and pl.cdiv(B, tm) < 2:
        tm = _round_up(pl.cdiv(B, 2), 8)

    # Pad batch rows only when B isn't tile-aligned (no copy in the aligned
    # deployment case); feature dims are never padded on the streamed arrays.
    b_pad = _round_up(B, tm)
    if b_pad != B:
        x2d = jnp.pad(x2d, ((0, b_pad - B), (0, 0)))

    w1, b1, w2, b2, w3, b3, w4, b4 = prepared_params
    weights = (w1, b1, w2, b2, w3, b3, w4, b4)

    def resident(a):
        # Constant index_map -> Pallas keeps the block resident in VMEM and
        # does not re-stream it across grid steps.
        return pl.BlockSpec(a.shape, lambda i: (0, 0))

    in_specs = [pl.BlockSpec((tm, D_IN), lambda i: (i, 0))] + [
        resident(a) for a in weights
    ]

    flops_per_row = 2 * (D_IN * P_H + P_H * P_Z + P_Z * P_H + P_H * D_IN)
    weight_bytes = sum(int(a.size) * a.dtype.itemsize for a in weights)
    cost = pl.CostEstimate(
        flops=flops_per_row * b_pad,
        transcendentals=b_pad * D_IN,
        bytes_accessed=b_pad * D_IN * 4
        + b_pad * D_IN * jnp.dtype(out_dtype).itemsize
        + weight_bytes,
    )

    out = pl.pallas_call(
        ae_kernel,
        out_shape=jax.ShapeDtypeStruct((b_pad, D_IN), out_dtype),
        grid=(b_pad // tm,),
        in_specs=in_specs,
        out_specs=pl.BlockSpec((tm, D_IN), lambda i: (i, 0)),
        compiler_params=pltpu.CompilerParams(
            dimension_semantics=("parallel",),
            vmem_limit_bytes=32 * 1024 * 1024,
        ),
        cost_estimate=cost,
    )(x2d, *weights)

    return out if b_pad == B else out[:B]


def _linear_init(key, fan_in, fan_out):
    """PyTorch-style nn.Linear init: U(-1/sqrt(fan_in), 1/sqrt(fan_in))."""
    kw, kb = jax.random.split(key)
    bound = 1.0 / math.sqrt(fan_in)
    w = jax.random.uniform(kw, (fan_in, fan_out), jnp.float32, -bound, bound)
    b = jax.random.uniform(kb, (1, fan_out), jnp.float32, -bound, bound)
    return w, b


def init_params(key):
    k1, k2, k3, k4 = jax.random.split(key, 4)
    return (
        _linear_init(k1, D_IN, D_H),   # fc1: 400 -> 1000
        _linear_init(k2, D_H, D_Z),    # fc2: 1000 -> 20
        _linear_init(k3, D_Z, D_H),    # fc3: 20 -> 1000
        _linear_init(k4, D_H, D_IN),   # fc4: 1000 -> 400
    )


def ae_reference(x, params):
    """Pure-JAX f32 reference of the same forward pass."""
    x2d = x.reshape(-1, D_IN).astype(jnp.float32)
    (w1, b1), (w2, b2), (w3, b3), (w4, b4) = params
    h1 = jax.nn.relu(x2d @ w1 + b1)
    z = jax.nn.relu(h1 @ w2 + b2)
    h3 = jax.nn.relu(z @ w3 + b3)
    return jax.nn.sigmoid(h3 @ w4 + b4)


if __name__ == "__main__":
    key = jax.random.PRNGKey(0)
    kx, kp = jax.random.split(key)

    # NCHW-style input (B=2, C=1, H=20, W=20) -> view(-1, 400) gives (2, 400).
    x = jax.random.normal(kx, (2, 1, 20, 20), dtype=jnp.float32)
    params = init_params(kp)
    prepped = prepare_params(params)

    y = ae_forward(x, prepped)
    y = jax.block_until_ready(y)

    assert y.shape == (2, D_IN), y.shape
    y_ref = ae_reference(x, params)
    # Loose tolerance: kernel matmul inputs are bf16 (f32 accumulation) and
    # the stored output is bf16; reference is full f32.
    assert jnp.allclose(y.astype(jnp.float32), y_ref, atol=5e-2), \
        "mismatch vs reference"

    print("KERNEL_OK")
</pallas_src>

<mosaic_0001>
module attributes {stable_mosaic.version = 11 : i64} {
  func.func @ae_kernel(%arg0: i32, %arg1: memref<8x400xf32, #tpu.memory_space<vmem>>, %arg2: memref<400x1024xbf16, #tpu.memory_space<vmem>>, %arg3: memref<1x1024xf32, #tpu.memory_space<vmem>>, %arg4: memref<1024x128xbf16, #tpu.memory_space<vmem>>, %arg5: memref<1x128xf32, #tpu.memory_space<vmem>>, %arg6: memref<128x1024xbf16, #tpu.memory_space<vmem>>, %arg7: memref<1x1024xf32, #tpu.memory_space<vmem>>, %arg8: memref<1024x400xbf16, #tpu.memory_space<vmem>>, %arg9: memref<1x400xf32, #tpu.memory_space<vmem>>, %arg10: memref<8x400xbf16, #tpu.memory_space<vmem>>) attributes {dimension_semantics = [#tpu.dimension_semantics<parallel>], iteration_bounds = array<i64: 1>, scalar_prefetch = 0 : i64, scratch_operands = 0 : i64, tpu.core_type = #tpu.core_type<tc>, window_params = [{transform_indices = @transform_0, window_bounds = array<i64: 8, 400>}, {pipeline_mode = #tpu.pipeline_mode<synchronous>, transform_indices = @transform_1, window_bounds = array<i64: 400, 1024>}, {pipeline_mode = #tpu.pipeline_mode<synchronous>, transform_indices = @transform_2, window_bounds = array<i64: 1, 1024>}, {pipeline_mode = #tpu.pipeline_mode<synchronous>, transform_indices = @transform_3, window_bounds = array<i64: 1024, 128>}, {pipeline_mode = #tpu.pipeline_mode<synchronous>, transform_indices = @transform_4, window_bounds = array<i64: 1, 128>}, {pipeline_mode = #tpu.pipeline_mode<synchronous>, transform_indices = @transform_5, window_bounds = array<i64: 128, 1024>}, {pipeline_mode = #tpu.pipeline_mode<synchronous>, transform_indices = @transform_6, window_bounds = array<i64: 1, 1024>}, {pipeline_mode = #tpu.pipeline_mode<synchronous>, transform_indices = @transform_7, window_bounds = array<i64: 1024, 400>}, {pipeline_mode = #tpu.pipeline_mode<synchronous>, transform_indices = @transform_8, window_bounds = array<i64: 1, 400>}, {transform_indices = @transform_9, window_bounds = array<i64: 8, 400>}]} {
    %c0 = arith.constant 0 : index
    %c0_0 = arith.constant 0 : index
    %0 = vector.load %arg1[%c0, %c0_0] : memref<8x400xf32, #tpu.memory_space<vmem>>, vector<8x400xf32>
    %1 = arith.truncf %0 : vector<8x400xf32> to vector<8x400xbf16>
    %c0_1 = arith.constant 0 : index
    %c0_2 = arith.constant 0 : index
    %2 = vector.load %arg2[%c0_1, %c0_2] : memref<400x1024xbf16, #tpu.memory_space<vmem>>, vector<400x1024xbf16>
    %cst = arith.constant dense<0.000000e+00> : vector<8x1024xf32>
    %3 = tpu.matmul %1, %2, %cst {dimension_numbers = #tpu.dot_dimension_numbers<[1], [0], [0], [1], [0, 0, 1, 1], [], []>} : vector<8x400xbf16>, vector<400x1024xbf16>, vector<8x1024xf32> -> vector<8x1024xf32>
    %c0_3 = arith.constant 0 : index
    %c0_4 = arith.constant 0 : index
    %4 = vector.load %arg3[%c0_3, %c0_4] : memref<1x1024xf32, #tpu.memory_space<vmem>>, vector<1x1024xf32>
    %5 = vector.broadcast %4 : vector<1x1024xf32> to vector<8x1024xf32>
    %6 = arith.addf %3, %5 : vector<8x1024xf32>
    %cst_5 = arith.constant 0.000000e+00 : f32
    %7 = vector.broadcast %cst_5 : f32 to vector<8x1024xf32>
    %8 = arith.maximumf %6, %7 : vector<8x1024xf32>
    %9 = arith.truncf %8 : vector<8x1024xf32> to vector<8x1024xbf16>
    %c0_6 = arith.constant 0 : index
    %c0_7 = arith.constant 0 : index
    %10 = vector.load %arg4[%c0_6, %c0_7] : memref<1024x128xbf16, #tpu.memory_space<vmem>>, vector<1024x128xbf16>
    %cst_8 = arith.constant dense<0.000000e+00> : vector<8x128xf32>
    %11 = tpu.matmul %9, %10, %cst_8 {dimension_numbers = #tpu.dot_dimension_numbers<[1], [0], [0], [1], [0, 0, 1, 1], [], []>} : vector<8x1024xbf16>, vector<1024x128xbf16>, vector<8x128xf32> -> vector<8x128xf32>
    %c0_9 = arith.constant 0 : index
    %c0_10 = arith.constant 0 : index
    %12 = vector.load %arg5[%c0_9, %c0_10] : memref<1x128xf32, #tpu.memory_space<vmem>>, vector<1x128xf32>
    %13 = vector.broadcast %12 : vector<1x128xf32> to vector<8x128xf32>
    %14 = arith.addf %11, %13 : vector<8x128xf32>
    %cst_11 = arith.constant 0.000000e+00 : f32
    %15 = vector.broadcast %cst_11 : f32 to vector<8x128xf32>
    %16 = arith.maximumf %14, %15 : vector<8x128xf32>
    %17 = arith.truncf %16 : vector<8x128xf32> to vector<8x128xbf16>
    %c0_12 = arith.constant 0 : index
    %c0_13 = arith.constant 0 : index
    %18 = vector.load %arg6[%c0_12, %c0_13] : memref<128x1024xbf16, #tpu.memory_space<vmem>>, vector<128x1024xbf16>
    %cst_14 = arith.constant dense<0.000000e+00> : vector<8x1024xf32>
    %19 = tpu.matmul %17, %18, %cst_14 {dimension_numbers = #tpu.dot_dimension_numbers<[1], [0], [0], [1], [0, 0, 1, 1], [], []>} : vector<8x128xbf16>, vector<128x1024xbf16>, vector<8x1024xf32> -> vector<8x1024xf32>
    %c0_15 = arith.constant 0 : index
    %c0_16 = arith.constant 0 : index
    %20 = vector.load %arg7[%c0_15, %c0_16] : memref<1x1024xf32, #tpu.memory_space<vmem>>, vector<1x1024xf32>
    %21 = vector.broadcast %20 : vector<1x1024xf32> to vector<8x1024xf32>
    %22 = arith.addf %19, %21 : vector<8x1024xf32>
    %cst_17 = arith.constant 0.000000e+00 : f32
    %23 = vector.broadcast %cst_17 : f32 to vector<8x1024xf32>
    %24 = arith.maximumf %22, %23 : vector<8x1024xf32>
    %25 = arith.truncf %24 : vector<8x1024xf32> to vector<8x1024xbf16>
    %c0_18 = arith.constant 0 : index
    %c0_19 = arith.constant 0 : index
    %26 = vector.load %arg8[%c0_18, %c0_19] : memref<1024x400xbf16, #tpu.memory_space<vmem>>, vector<1024x400xbf16>
    %cst_20 = arith.constant dense<0.000000e+00> : vector<8x400xf32>
    %27 = tpu.matmul %25, %26, %cst_20 {dimension_numbers = #tpu.dot_dimension_numbers<[1], [0], [0], [1], [0, 0, 1, 1], [], []>} : vector<8x1024xbf16>, vector<1024x400xbf16>, vector<8x400xf32> -> vector<8x400xf32>
    %c0_21 = arith.constant 0 : index
    %c0_22 = arith.constant 0 : index
    %28 = vector.load %arg9[%c0_21, %c0_22] : memref<1x400xf32, #tpu.memory_space<vmem>>, vector<1x400xf32>
    %29 = vector.broadcast %28 : vector<1x400xf32> to vector<8x400xf32>
    %30 = arith.addf %27, %29 : vector<8x400xf32>
    %31 = arith.negf %30 : vector<8x400xf32>
    %32 = math.exp %31 : vector<8x400xf32>
    %cst_23 = arith.constant 1.000000e+00 : f32
    %33 = vector.broadcast %cst_23 : f32 to vector<8x400xf32>
    %34 = arith.addf %33, %32 : vector<8x400xf32>
    %35 = arith.divf %33, %34 : vector<8x400xf32>
    %36 = arith.truncf %35 : vector<8x400xf32> to vector<8x400xbf16>
    %c0_24 = arith.constant 0 : index
    %c0_25 = arith.constant 0 : index
    %37 = vector.load %arg10[%c0_24, %c0_25] : memref<8x400xbf16, #tpu.memory_space<vmem>>, vector<8x400xbf16>
    tpu.vector_store %arg10[%c0_24, %c0_25], %36 {strides = array<i32>} : memref<8x400xbf16, #tpu.memory_space<vmem>>, vector<8x400xbf16>,
    return
  }
  func.func @transform_0(%arg0: i32) -> (i32, i32) {
    %c0_i32 = arith.constant 0 : i32
    %c0_i32_0 = arith.constant 0 : i32
    return %arg0, %c0_i32 : i32, i32
  }
  func.func @transform_1(%arg0: i32) -> (i32, i32) {
    %c0_i32 = arith.constant 0 : i32
    %c0_i32_0 = arith.constant 0 : i32
    %c0_i32_1 = arith.constant 0 : i32
    return %c0_i32, %c0_i32_0 : i32, i32
  }
  func.func @transform_2(%arg0: i32) -> (i32, i32) {
    %c0_i32 = arith.constant 0 : i32
    %c0_i32_0 = arith.constant 0 : i32
    %c0_i32_1 = arith.constant 0 : i32
    return %c0_i32, %c0_i32_0 : i32, i32
  }
  func.func @transform_3(%arg0: i32) -> (i32, i32) {
    %c0_i32 = arith.constant 0 : i32
    %c0_i32_0 = arith.constant 0 : i32
    %c0_i32_1 = arith.constant 0 : i32
    return %c0_i32, %c0_i32_0 : i32, i32
  }
  func.func @transform_4(%arg0: i32) -> (i32, i32) {
    %c0_i32 = arith.constant 0 : i32
    %c0_i32_0 = arith.constant 0 : i32
    %c0_i32_1 = arith.constant 0 : i32
    return %c0_i32, %c0_i32_0 : i32, i32
  }
  func.func @transform_5(%arg0: i32) -> (i32, i32) {
    %c0_i32 = arith.constant 0 : i32
    %c0_i32_0 = arith.constant 0 : i32
    %c0_i32_1 = arith.constant 0 : i32
    return %c0_i32, %c0_i32_0 : i32, i32
  }
  func.func @transform_6(%arg0: i32) -> (i32, i32) {
    %c0_i32 = arith.constant 0 : i32
    %c0_i32_0 = arith.constant 0 : i32
    %c0_i32_1 = arith.constant 0 : i32
    return %c0_i32, %c0_i32_0 : i32, i32
  }
  func.func @transform_7(%arg0: i32) -> (i32, i32) {
    %c0_i32 = arith.constant 0 : i32
    %c0_i32_0 = arith.constant 0 : i32
    %c0_i32_1 = arith.constant 0 : i32
    return %c0_i32, %c0_i32_0 : i32, i32
  }
  func.func @transform_8(%arg0: i32) -> (i32, i32) {
    %c0_i32 = arith.constant 0 : i32
    %c0_i32_0 = arith.constant 0 : i32
    %c0_i32_1 = arith.constant 0 : i32
    return %c0_i32, %c0_i32_0 : i32, i32
  }
  func.func @transform_9(%arg0: i32) -> (i32, i32) {
    %c0_i32 = arith.constant 0 : i32
    %c0_i32_0 = arith.constant 0 : i32
    return %arg0, %c0_i32 : i32, i32
  }
}

</mosaic_0001>

<bundles_post_ra>
// kernel: tpu_custom_call.1
= control target key start
LH: loop header
LB: loop body
LE: loop exit
PB: predicated region body
PF: predicated region fallthrough
CT: control target
= control target key end

     0   :  { %vm1284_vm0 = vcmask 130048   ;;  %s8006_s0 = inlined_call_operand.vmem [shape: f32[8,400], index: 0, kind: input, shape index: {}]   ;;  %s8007_s1 = inlined_call_operand.vmem [shape: bf16[400,1024], index: 1, kind: input, shape index: {}]   ;;  %s8008_s2 = inlined_call_operand.vmem [shape: f32[1,1024], index: 2, kind: input, shape index: {}]   ;;  %s8009_s3 = inlined_call_operand.vmem [shape: bf16[1024,128], index: 3, kind: input, shape index: {}]   ;;  %s8010_s4 = inlined_call_operand.vmem [shape: f32[1,128], index: 4, kind: input, shape index: {}]   ;;  %s8011_s5 = inlined_call_operand.vmem [shape: bf16[128,1024], index: 5, kind: input, shape index: {}]   ;;  %s8012_s6 = inlined_call_operand.vmem [shape: f32[1,1024], index: 6, kind: input, shape index: {}]   ;;  %s8013_s7 = inlined_call_operand.vmem [shape: bf16[1024,400], index: 7, kind: input, shape index: {}]   ;;  %s8014_s8 = inlined_call_operand.vmem [shape: f32[1,400], index: 8, kind: input, shape index: {}]   ;;  %s8015_s9 = inlined_call_operand.hbm [shape: bf16[8,400], index: 9, kind: output, shape index: {}]  }
   0x1   :  { %v98_v0 = vld [vmem:[%s8007_s1 + $0x1c0] sm:$0xff]  ;;  %v37_v35 = vld [vmem:[%s8006_s0 + $0x18] sm:$0xff]  ;;  %v35_v58 = vld [vmem:[%s8006_s0 + $0x8] sm:$0xff] }
   0x2   :  { %v102_v1 = vld [vmem:[%s8007_s1 + $0x1e0] sm:$0xff]  ;;  %v6152_v38 = vpack.c.bf16 %v37_v35, %v37_v35  ;;  %v6195_v61 = vpack.c.bf16 %v35_v58, %v35_v58 }
   0x3   :  { %v226_v2 = vld [vmem:[%s8007_s1 + $0x5c0] sm:$0xff]  ;;  %v4921_v3 = vcombine.high %v98_v0, %v102_v1  ;;  %v4920_v5 = vcombine.low %v98_v0, %v102_v1 }
   0x4   :  { %v230_v4 = vld [vmem:[%s8007_s1 + $0x5e0] sm:$0xff]  ;;  %5064 = vmatprep.mubr.msk.bf16.mxu1 %vm1284_vm0, %v6152_v38  ;;  %1320 = vmatprep.mubr.bf16.mxu0 %v6195_v61 }
   0x5   :  { %v90_v6 = vld [vmem:[%s8007_s1 + $0x180] sm:$0xff]  ;;  %v5049_v8 = vcombine.high %v226_v2, %v230_v4  ;;  %v5048_v9 = vcombine.low %v226_v2, %v230_v4  ;;  %1288 = vmatprep.subr.bf16.mxu0 %v4921_v3 }
   0x6   :  { %v94_v7 = vld [vmem:[%s8007_s1 + $0x1a0] sm:$0xff]  ;;  %1289 = vmatpush1.bf16.msra.mxu0 %v4920_v5 }
   0x7   :  { %v4913_v10 = vcombine.high %v90_v6, %v94_v7  ;;  %v218_v11 = vld [vmem:[%s8007_s1 + $0x580] sm:$0xff]  ;;  %1329 = vmatprep.subr.bf16.mxu1 %v5049_v8  ;;  %v4912_v18 = vcombine.low %v90_v6, %v94_v7 }
   0x8   :  { %v222_v12 = vld [vmem:[%s8007_s1 + $0x5a0] sm:$0xff]  ;;  %1330 = vmatpush1.bf16.msra.mxu1 %v5048_v9 }
   0x9   :  { %v82_v13 = vld [vmem:[%s8007_s1 + $0x140] sm:$0xff]  ;;  %v5041_v14 = vcombine.high %v218_v11, %v222_v12  ;;  %1290 = vmatprep.subr.bf16.mxu0 %v4913_v10  ;;  %v5040_v19 = vcombine.low %v218_v11, %v222_v12  ;;  %v99_v12 = vld [vmem:[%s8007_s1 + $0x1c8] sm:$0xff] }
   0xa   :  { %v86_v15 = vld [vmem:[%s8007_s1 + $0x160] sm:$0xff]  ;;  %1291 = vmatpush1.bf16.msra.mxu0 %v4912_v18 }
   0xb   :  { %v210_v16 = vld [vmem:[%s8007_s1 + $0x540] sm:$0xff]  ;;  %v4905_v20 = vcombine.high %v82_v13, %v86_v15  ;;  %1331 = vmatprep.subr.bf16.mxu1 %v5041_v14  ;;  %v4904_v26 = vcombine.low %v82_v13, %v86_v15  ;;  %v103_v13 = vld [vmem:[%s8007_s1 + $0x1e8] sm:$0xff] }
   0xc   :  { %v214_v17 = vld [vmem:[%s8007_s1 + $0x560] sm:$0xff]  ;;  %1332 = vmatpush1.bf16.msra.mxu1 %v5040_v19  ;;  %v4923_v18 = vcombine.high %v99_v12, %v103_v13 }
   0xd   :  { %v5033_v21 = vcombine.high %v210_v16, %v214_v17  ;;  %v74_v22 = vld [vmem:[%s8007_s1 + $0x100] sm:$0xff]  ;;  %1292 = vmatprep.subr.bf16.mxu0 %v4905_v20  ;;  %v5032_v27 = vcombine.low %v210_v16, %v214_v17  ;;  %v36_v17 = vld [vmem:[%s8006_s0 + $0x10] sm:$0xff] }
   0xe   :  { %v78_v23 = vld [vmem:[%s8007_s1 + $0x120] sm:$0xff]  ;;  %1293 = vmatpush1.bf16.msra.mxu0 %v4904_v26 }
   0xf   :  { %v202_v24 = vld [vmem:[%s8007_s1 + $0x500] sm:$0xff]  ;;  %v4897_v28 = vcombine.high %v74_v22, %v78_v23  ;;  %1333 = vmatprep.subr.bf16.mxu1 %v5033_v21  ;;  %v4896_v34 = vcombine.low %v74_v22, %v78_v23  ;;  %v91_v21 = vld [vmem:[%s8007_s1 + $0x188] sm:$0xff]  ;;  %v6237_v23 = vpack.c.bf16 %v36_v17, %v36_v17 }
  0x10   :  { %v206_v25 = vld [vmem:[%s8007_s1 + $0x520] sm:$0xff]  ;;  %1334 = vmatpush1.bf16.msra.mxu1 %v5032_v27  ;;  %v95_v22 = vld [vmem:[%s8007_s1 + $0x1a8] sm:$0xff] }
  0x11   :  { %v5025_v29 = vcombine.high %v202_v24, %v206_v25  ;;  %v66_v30 = vld [vmem:[%s8007_s1 + $0xc0] sm:$0xff]  ;;  %1294 = vmatprep.subr.bf16.mxu0 %v4897_v28  ;;  %v5024_v36 = vcombine.low %v202_v24, %v206_v25  ;;  %v4922_v25 = vcombine.low %v99_v12, %v103_v13  ;;  %v4915_v27 = vcombine.high %v91_v21, %v95_v22 }
  0x12   :  { %v70_v31 = vld [vmem:[%s8007_s1 + $0xe0] sm:$0xff]  ;;  %1295 = vmatpush1.bf16.msra.mxu0 %v4896_v34 }
  0x13   :  { %v194_v32 = vld [vmem:[%s8007_s1 + $0x4c0] sm:$0xff]  ;;  %v4889_v37 = vcombine.high %v66_v30, %v70_v31  ;;  %1335 = vmatprep.subr.bf16.mxu1 %v5025_v29  ;;  %v4888_v44 = vcombine.low %v66_v30, %v70_v31  ;;  %v83_v30 = vld [vmem:[%s8007_s1 + $0x148] sm:$0xff] }
  0x14   :  { %v198_v33 = vld [vmem:[%s8007_s1 + $0x4e0] sm:$0xff]  ;;  %1336 = vmatpush1.bf16.msra.mxu1 %v5024_v36  ;;  %v87_v31 = vld [vmem:[%s8007_s1 + $0x168] sm:$0xff] }
  0x15   :  { %v5017_v39 = vcombine.high %v194_v32, %v198_v33  ;;  %v58_v40 = vld [vmem:[%s8007_s1 + $0x80] sm:$0xff]  ;;  %1296 = vmatprep.subr.bf16.mxu0 %v4889_v37  ;;  %v5016_v45 = vcombine.low %v194_v32, %v198_v33  ;;  %v4914_v33 = vcombine.low %v91_v21, %v95_v22  ;;  %v4907_v35 = vcombine.high %v83_v30, %v87_v31 }
  0x16   :  { %v62_v41 = vld [vmem:[%s8007_s1 + $0xa0] sm:$0xff]  ;;  %1297 = vmatpush1.bf16.msra.mxu0 %v4888_v44 }
  0x17   :  { %v186_v42 = vld [vmem:[%s8007_s1 + $0x480] sm:$0xff]  ;;  %v4881_v46 = vcombine.high %v58_v40, %v62_v41  ;;  %1337 = vmatprep.subr.bf16.mxu1 %v5017_v39  ;;  %v4880_v52 = vcombine.low %v58_v40, %v62_v41  ;;  %v75_v39 = vld [vmem:[%s8007_s1 + $0x108] sm:$0xff] }
  0x18   :  { %v190_v43 = vld [vmem:[%s8007_s1 + $0x4a0] sm:$0xff]  ;;  %1338 = vmatpush1.bf16.msra.mxu1 %v5016_v45  ;;  %v79_v40 = vld [vmem:[%s8007_s1 + $0x128] sm:$0xff] }
  0x19   :  { %v5009_v47 = vcombine.high %v186_v42, %v190_v43  ;;  %v50_v48 = vld [vmem:[%s8007_s1 + $0x40] sm:$0xff]  ;;  %1298 = vmatprep.subr.bf16.mxu0 %v4881_v46  ;;  %v5008_v53 = vcombine.low %v186_v42, %v190_v43  ;;  %v4906_v42 = vcombine.low %v83_v30, %v87_v31  ;;  %v4899_v44 = vcombine.high %v75_v39, %v79_v40 }
  0x1a   :  { %v54_v49 = vld [vmem:[%s8007_s1 + $0x60] sm:$0xff]  ;;  %1299 = vmatpush1.bf16.msra.mxu0 %v4880_v52 }
  0x1b   :  { %v178_v50 = vld [vmem:[%s8007_s1 + $0x440] sm:$0xff]  ;;  %v4873_v54 = vcombine.high %v50_v48, %v54_v49  ;;  %1339 = vmatprep.subr.bf16.mxu1 %v5009_v47  ;;  %v4872_v62 = vcombine.low %v50_v48, %v54_v49  ;;  %v67_v47 = vld [vmem:[%s8007_s1 + $0xc8] sm:$0xff] }
  0x1c   :  { %v182_v51 = vld [vmem:[%s8007_s1 + $0x460] sm:$0xff]  ;;  %1340 = vmatpush1.bf16.msra.mxu1 %v5008_v53  ;;  %v71_v48 = vld [vmem:[%s8007_s1 + $0xe8] sm:$0xff] }
  0x1d   :  { %v5001_v55 = vcombine.high %v178_v50, %v182_v51  ;;  %v42_v56 = vld [vmem:[%s8007_s1] sm:$0xff]  ;;  %1300 = vmatprep.subr.bf16.mxu0 %v4873_v54  ;;  %v5000_v63 = vcombine.low %v178_v50, %v182_v51  ;;  %v4898_v50 = vcombine.low %v75_v39, %v79_v40  ;;  %v4891_v52 = vcombine.high %v67_v47, %v71_v48  ;;  %v195_v39 = vld [vmem:[%s8007_s1 + $0x4c8] sm:$0xff] }
  0x1e   :  { %v46_v57 = vld [vmem:[%s8007_s1 + $0x20] sm:$0xff]  ;;  %1301 = vmatpush1.bf16.msra.mxu0 %v4872_v62  ;;  %v4890_v58 = vcombine.low %v67_v47, %v71_v48  ;;  %v199_v40 = vld [vmem:[%s8007_s1 + $0x4e8] sm:$0xff] }
  0x1f   :  { %v170_v59 = vld [vmem:[%s8007_s1 + $0x400] sm:$0xff]  ;;  %v4865_v0 = vcombine.high %v42_v56, %v46_v57  ;;  %1341 = vmatprep.subr.bf16.mxu1 %v5001_v55  ;;  %v4864_v6 = vcombine.low %v42_v56, %v46_v57  ;;  %v59_v55 = vld [vmem:[%s8007_s1 + $0x88] sm:$0xff] }
  0x20   :  { %v174_v60 = vld [vmem:[%s8007_s1 + $0x420] sm:$0xff]  ;;  %1342 = vmatpush1.bf16.msra.mxu1 %v5000_v63  ;;  %v63_v56 = vld [vmem:[%s8007_s1 + $0xa8] sm:$0xff] }
  0x21   :  { %v4993_v1 = vcombine.high %v170_v59, %v174_v60  ;;  %v162_v2 = vld [vmem:[%s8007_s1 + $0x3c0] sm:$0xff]  ;;  %1302 = vmatprep.subr.bf16.mxu0 %v4865_v0  ;;  %v4992_v7 = vcombine.low %v170_v59, %v174_v60  ;;  %v4883_v60 = vcombine.high %v59_v55, %v63_v56  ;;  %v51_v0 = vld [vmem:[%s8007_s1 + $0x48] sm:$0xff] }
  0x22   :  { %v166_v3 = vld [vmem:[%s8007_s1 + $0x3e0] sm:$0xff]  ;;  %1303 = vmatpush1.bf16.msra.mxu0 %v4864_v6  ;;  %v227_v6 = vld [vmem:[%s8007_s1 + $0x5c8] sm:$0xff] }
  0x23   :  { %v234_v4 = vld [vmem:[%s8007_s1 + $0x600] sm:$0xff]  ;;  %v4985_v8 = vcombine.high %v162_v2, %v166_v3  ;;  %1343 = vmatprep.subr.bf16.mxu1 %v4993_v1  ;;  %v4984_v14 = vcombine.low %v162_v2, %v166_v3  ;;  %v55_v1 = vld [vmem:[%s8007_s1 + $0x68] sm:$0xff]  ;;  %v4882_v3 = vcombine.low %v59_v55, %v63_v56 }
  0x24   :  { %v238_v5 = vld [vmem:[%s8007_s1 + $0x620] sm:$0xff]  ;;  %1344 = vmatpush1.bf16.msra.mxu1 %v4992_v7  ;;  %v231_v7 = vld [vmem:[%s8007_s1 + $0x5e8] sm:$0xff]  ;;  %v4874_v12 = vcombine.low %v51_v0, %v55_v1 }
  0x25   :  { %v5057_v9 = vcombine.high %v234_v4, %v238_v5  ;;  %v154_v10 = vld [vmem:[%s8007_s1 + $0x380] sm:$0xff]  ;;  %1304 = vmatprep.subr.bf16.mxu0 %v4985_v8  ;;  %v5056_v15 = vcombine.low %v234_v4, %v238_v5  ;;  %v4875_v5 = vcombine.high %v51_v0, %v55_v1  ;;  %v43_v8 = vld [vmem:[%s8007_s1 + $0x8] sm:$0xff]  ;;  %v5051_v13 = vcombine.high %v227_v6, %v231_v7 }
  0x26   :  { %v158_v11 = vld [vmem:[%s8007_s1 + $0x3a0] sm:$0xff]  ;;  %1305 = vmatpush2.bf16.msra.mxu0 %v4984_v14  ;;  %v187_v47 = vld [vmem:[%s8007_s1 + $0x488] sm:$0xff] }
  0x27   :  { %v4977_v16 = vcombine.high %v154_v10, %v158_v11  ;;  %1359 = vmatprep.subr.bf16.mxu1 %v5057_v9  ;;  %v146_v19 = vld [vmem:[%s8007_s1 + $0x340] sm:$0xff]  ;;  %v4976_v24 = vcombine.low %v154_v10, %v158_v11  ;;  %v47_v9 = vld [vmem:[%s8007_s1 + $0x28] sm:$0xff] }
  0x28   :  { %v150_v20 = vld [vmem:[%s8007_s1 + $0x360] sm:$0xff]  ;;  %1360 = vmatpush2.bf16.msra.mxu1 %v5056_v15  ;;  %v4867_v14 = vcombine.high %v43_v8, %v47_v9  ;;  %v219_v15 = vld [vmem:[%s8007_s1 + $0x588] sm:$0xff]  ;;  %v4866_v21 = vcombine.low %v43_v8, %v47_v9 }
  0x29   :  { %1306 = vmatprep.subr.bf16.mxu0 %v4977_v16  ;;  %v4969_v26 = vcombine.high %v146_v19, %v150_v20  ;;  %1370 = vmatprep.subr.bf16.mxu1 %v4923_v18  ;;  %v138_v28 = vld [vmem:[%s8007_s1 + $0x300] sm:$0xff]  ;;  %v4968_v32 = vcombine.low %v146_v19, %v150_v20  ;;  %v223_v16 = vld [vmem:[%s8007_s1 + $0x5a8] sm:$0xff]  ;;  %v5050_v20 = vcombine.low %v227_v6, %v231_v7 }
  0x2a   :  { %v142_v29 = vld [vmem:[%s8007_s1 + $0x320] sm:$0xff]  ;;  %1307 = vmatpush2.bf16.msra.mxu0 %v4976_v24  ;;  %v163_v18 = vld [vmem:[%s8007_s1 + $0x3c8] sm:$0xff]  ;;  %v5043_v22 = vcombine.high %v219_v15, %v223_v16 }
  0x2b   :  { %1362 = vmatmul.mubr.bf16.vlgmr.msra.gmra.mxu1 %v6237_v23  ;;  %1308 = vmatprep.subr.bf16.mxu0 %v4969_v26  ;;  %v4961_v34 = vcombine.high %v138_v28, %v142_v29  ;;  %v130_v36 = vld [vmem:[%s8007_s1 + $0x2c0] sm:$0xff]  ;;  %v4960_v41 = vcombine.low %v138_v28, %v142_v29  ;;  %v167_v19 = vld [vmem:[%s8007_s1 + $0x3e8] sm:$0xff]  ;;  %v5042_v29 = vcombine.low %v219_v15, %v223_v16  ;;  %v100_v16 = vld [vmem:[%s8007_s1 + $0x1d0] sm:$0xff] }
  0x2c   :  { %1371 = vmatpush1.bf16.msra.mxu1 %v4922_v25  ;;  %v134_v37 = vld [vmem:[%s8007_s1 + $0x2e0] sm:$0xff]  ;;  %1402 = vmatprep.mubr.bf16.mxu1 %v6195_v61  ;;  %v155_v24 = vld [vmem:[%s8007_s1 + $0x388] sm:$0xff]  ;;  %v4987_v26 = vcombine.high %v163_v18, %v167_v19  ;;  %v4986_v30 = vcombine.low %v163_v18, %v167_v19  ;;  %v104_v18 = vld [vmem:[%s8007_s1 + $0x1f0] sm:$0xff] }
  0x2d   :  { %1372 = vmatprep.subr.bf16.mxu1 %v4915_v27  ;;  %v4953_v43 = vcombine.high %v130_v36, %v134_v37  ;;  %v122_v45 = vld [vmem:[%s8007_s1 + $0x280] sm:$0xff]  ;;  %v4952_v49 = vcombine.low %v130_v36, %v134_v37  ;;  %v159_v25 = vld [vmem:[%s8007_s1 + $0x3a8] sm:$0xff] }
  0x2e   :  { %1309 = vmatpush2.bf16.msra.mxu0 %v4968_v32  ;;  %v126_v46 = vld [vmem:[%s8007_s1 + $0x2a0] sm:$0xff]  ;;  %v211_v27 = vld [vmem:[%s8007_s1 + $0x548] sm:$0xff] }
  0x2f   :  { %1310 = vmatprep.subr.bf16.mxu0 %v4961_v34  ;;  %v4945_v51 = vcombine.high %v122_v45, %v126_v46  ;;  %v114_v53 = vld [vmem:[%s8007_s1 + $0x240] sm:$0xff]  ;;  %v4944_v57 = vcombine.low %v122_v45, %v126_v46  ;;  %v215_v28 = vld [vmem:[%s8007_s1 + $0x568] sm:$0xff] }
  0x30   :  { %1373 = vmatpush1.bf16.msra.mxu1 %v4914_v33  ;;  %v118_v54 = vld [vmem:[%s8007_s1 + $0x260] sm:$0xff]  ;;  %v5035_v31 = vcombine.high %v211_v27, %v215_v28  ;;  %v147_v32 = vld [vmem:[%s8007_s1 + $0x348] sm:$0xff]  ;;  %v5034_v37 = vcombine.low %v211_v27, %v215_v28  ;;  %v96_v27 = vld [vmem:[%s8007_s1 + $0x1b0] sm:$0xff] }
  0x31   :  { %1374 = vmatprep.subr.bf16.mxu1 %v4907_v35  ;;  %v4937_v59 = vcombine.high %v114_v53, %v118_v54  ;;  %v106_v62 = vld [vmem:[%s8007_s1 + $0x200] sm:$0xff]  ;;  %v4936_v2 = vcombine.low %v114_v53, %v118_v54  ;;  %v151_v33 = vld [vmem:[%s8007_s1 + $0x368] sm:$0xff]  ;;  %v4979_v35 = vcombine.high %v155_v24, %v159_v25  ;;  %v5018_v54 = vcombine.low %v195_v39, %v199_v40 }
  0x32   :  { %1311 = vmatpush2.bf16.msra.mxu0 %v4960_v41  ;;  %v110_v63 = vld [vmem:[%s8007_s1 + $0x220] sm:$0xff]  ;;  %v203_v34 = vld [vmem:[%s8007_s1 + $0x508] sm:$0xff]  ;;  %v4978_v41 = vcombine.low %v155_v24, %v159_v25  ;;  %v4971_v45 = vcombine.high %v147_v32, %v151_v33 }
  0x33   :  { %1312 = vmatprep.subr.bf16.mxu0 %v4953_v43  ;;  %v4929_v4 = vcombine.high %v106_v62, %v110_v63  ;;  %v4928_v10 = vcombine.low %v106_v62, %v110_v63  ;;  %v34_v11 = vld [vmem:[%s8006_s0] sm:$0xff]  ;;  %v207_v36 = vld [vmem:[%s8007_s1 + $0x528] sm:$0xff] }
  0x34   :  { %1375 = vmatpush1.bf16.msra.mxu1 %v4906_v42  ;;  %v6322_v17 = vpack.c.bf16 %v34_v11, %v34_v11  ;;  %v5027_v42 = vcombine.high %v203_v34, %v207_v36  ;;  %v139_v43 = vld [vmem:[%s8007_s1 + $0x308] sm:$0xff]  ;;  %v5026_v46 = vcombine.low %v203_v34, %v207_v36  ;;  %v84_v34 = vld [vmem:[%s8007_s1 + $0x150] sm:$0xff] }
  0x35   :  { %1376 = vmatprep.subr.bf16.mxu1 %v4899_v44  ;;  %v143_v44 = vld [vmem:[%s8007_s1 + $0x328] sm:$0xff] }
  0x36   :  { %1313 = vmatpush2.bf16.msra.mxu0 %v4952_v49  ;;  %v191_v48 = vld [vmem:[%s8007_s1 + $0x4a8] sm:$0xff]  ;;  %v4970_v49 = vcombine.low %v147_v32, %v151_v33  ;;  %v4963_v53 = vcombine.high %v139_v43, %v143_v44  ;;  %v4924_v33 = vcombine.low %v100_v16, %v104_v18 }
  0x37   :  { %1314 = vmatprep.subr.bf16.mxu0 %v4945_v51  ;;  %v131_v51 = vld [vmem:[%s8007_s1 + $0x2c8] sm:$0xff]  ;;  %v5010_v63 = vcombine.low %v187_v47, %v191_v48 }
  0x38   :  { %1377 = vmatpush1.bf16.msra.mxu1 %v4898_v50  ;;  %v5019_v50 = vcombine.high %v195_v39, %v199_v40  ;;  %v179_v55 = vld [vmem:[%s8007_s1 + $0x448] sm:$0xff]  ;;  %v212_v39 = vld [vmem:[%s8007_s1 + $0x550] sm:$0xff] }
  0x39   :  { %1378 = vmatprep.subr.bf16.mxu1 %v4891_v52  ;;  %v135_v52 = vld [vmem:[%s8007_s1 + $0x2e8] sm:$0xff]  ;;  %v216_v40 = vld [vmem:[%s8007_s1 + $0x570] sm:$0xff] }
  0x3a   :  { %1315 = vmatpush2.bf16.msra.mxu0 %v4944_v57  ;;  %v183_v56 = vld [vmem:[%s8007_s1 + $0x468] sm:$0xff]  ;;  %v4962_v57 = vcombine.low %v139_v43, %v143_v44  ;;  %v4955_v62 = vcombine.high %v131_v51, %v135_v52  ;;  %v76_v43 = vld [vmem:[%s8007_s1 + $0x110] sm:$0xff] }
  0x3b   :  { %1316 = vmatprep.subr.bf16.mxu0 %v4937_v59  ;;  %v123_v59 = vld [vmem:[%s8007_s1 + $0x288] sm:$0xff]  ;;  %v5002_v7 = vcombine.low %v179_v55, %v183_v56  ;;  %v80_v44 = vld [vmem:[%s8007_s1 + $0x130] sm:$0xff] }
  0x3c   :  { %1379 = vmatpush1.bf16.msra.mxu1 %v4890_v58  ;;  %v5011_v58 = vcombine.high %v187_v47, %v191_v48  ;;  %v171_v0 = vld [vmem:[%s8007_s1 + $0x408] sm:$0xff]  ;;  %v204_v47 = vld [vmem:[%s8007_s1 + $0x510] sm:$0xff] }
  0x3d   :  { %1380 = vmatprep.subr.bf16.mxu1 %v4883_v60  ;;  %v127_v60 = vld [vmem:[%s8007_s1 + $0x2a8] sm:$0xff]  ;;  %v208_v48 = vld [vmem:[%s8007_s1 + $0x530] sm:$0xff] }
  0x3e   :  { %1317 = vmatpush2.bf16.msra.mxu0 %v4936_v2  ;;  %v175_v1 = vld [vmem:[%s8007_s1 + $0x428] sm:$0xff]  ;;  %v4954_v2 = vcombine.low %v131_v51, %v135_v52  ;;  %v4947_v6 = vcombine.high %v123_v59, %v127_v60  ;;  %v5036_v51 = vcombine.low %v212_v39, %v216_v40  ;;  %v4901_v52 = vcombine.high %v76_v43, %v80_v44 }
  0x3f   :  { %1318 = vmatprep.subr.bf16.mxu0 %v4929_v4  ;;  %v115_v4 = vld [vmem:[%s8007_s1 + $0x248] sm:$0xff]  ;;  %v4995_v11 = vcombine.high %v171_v0, %v175_v1  ;;  %v4994_v15 = vcombine.low %v171_v0, %v175_v1  ;;  %v188_v0 = vld [vmem:[%s8007_s1 + $0x490] sm:$0xff] }
  0x40   :  { %1381 = vmatpush1.bf16.msra.mxu1 %v4882_v3  ;;  %v5003_v3 = vcombine.high %v179_v55, %v183_v56  ;;  %v235_v8 = vld [vmem:[%s8007_s1 + $0x608] sm:$0xff]  ;;  %v72_v55 = vld [vmem:[%s8007_s1 + $0xf0] sm:$0xff] }
  0x41   :  { %1382 = vmatprep.subr.bf16.mxu1 %v4875_v5  ;;  %v119_v5 = vld [vmem:[%s8007_s1 + $0x268] sm:$0xff]  ;;  %v196_v56 = vld [vmem:[%s8007_s1 + $0x4d0] sm:$0xff] }
  0x42   :  { %1319 = vmatpush2.bf16.msra.mxu0 %v4928_v10  ;;  %v239_v9 = vld [vmem:[%s8007_s1 + $0x628] sm:$0xff]  ;;  %v4946_v10 = vcombine.low %v123_v59, %v127_v60  ;;  %v4938_v19 = vcombine.low %v115_v4, %v119_v5  ;;  %v60_v59 = vld [vmem:[%s8007_s1 + $0x90] sm:$0xff] }
  0x43   :  { %1411 = vmatprep.subr.bf16.mxu0 %v5051_v13  ;;  %v111_v13 = vld [vmem:[%s8007_s1 + $0x228] sm:$0xff]  ;;  %v5058_v25 = vcombine.low %v235_v8, %v239_v9  ;;  %v64_v60 = vld [vmem:[%s8007_s1 + $0xb0] sm:$0xff] }
  0x44   :  { %1383 = vmatpush1.bf16.msra.mxu1 %v4874_v12  ;;  %v107_v12 = vld [vmem:[%s8007_s1 + $0x208] sm:$0xff]  ;;  %v192_v1 = vld [vmem:[%s8007_s1 + $0x4b0] sm:$0xff] }
  0x45   :  { %1384 = vmatprep.subr.bf16.mxu1 %v4867_v14  ;;  %1321 = vmatmul.mubr.bf16.vlgmr.msra.gmra.mxu0 %v6322_v17  ;;  %v4939_v14 = vcombine.high %v115_v4, %v119_v5  ;;  %v4931_v24 = vcombine.high %v107_v12, %v111_v13  ;;  %v4930_v28 = vcombine.low %v107_v12, %v111_v13  ;;  %v52_v4 = vld [vmem:[%s8007_s1 + $0x50] sm:$0xff] }
  0x46   :  { %1412 = vmatpush1.bf16.msra.mxu0 %v5050_v20  ;;  %5065 = vmatprep.mubr.msk.bf16.mxu0 %vm1284_vm0, %v6152_v38  ;;  %v5059_v20 = vcombine.high %v235_v8, %v239_v9  ;;  %v56_v5 = vld [vmem:[%s8007_s1 + $0x70] sm:$0xff] }
  0x47   :  { %1413 = vmatprep.subr.bf16.mxu0 %v5043_v22  ;;  %v232_v22 = vld [vmem:[%s8007_s1 + $0x5f0] sm:$0xff] }
  0x48   :  { %1385 = vmatpush1.bf16.msra.mxu1 %v4866_v21  ;;  %v228_v21 = vld [vmem:[%s8007_s1 + $0x5d0] sm:$0xff] }
  0x49   :  { %1386 = vmatprep.subr.bf16.mxu1 %v4987_v26  ;;  %v92_v26 = vld [vmem:[%s8007_s1 + $0x190] sm:$0xff]  ;;  %v5053_v32 = vcombine.high %v228_v21, %v232_v22  ;;  %v5052_v36 = vcombine.low %v228_v21, %v232_v22 }
  0x4a   :  { %1414 = vmatpush1.bf16.msra.mxu0 %v5042_v29  ;;  %v4925_v29 = vcombine.high %v100_v16, %v104_v18  ;;  %v180_v8 = vld [vmem:[%s8007_s1 + $0x450] sm:$0xff] }
  0x4b   :  { %1415 = vmatprep.subr.bf16.mxu0 %v5035_v31  ;;  %v224_v31 = vld [vmem:[%s8007_s1 + $0x5b0] sm:$0xff] }
  0x4c   :  { %1387 = vmatpush2.bf16.msra.mxu1 %v4986_v30  ;;  %v220_v30 = vld [vmem:[%s8007_s1 + $0x590] sm:$0xff] }
  0x4d   :  { %1388 = vmatprep.subr.bf16.mxu1 %v4979_v35  ;;  %v88_v35 = vld [vmem:[%s8007_s1 + $0x170] sm:$0xff] }
  0x4e   :  { %1416 = vmatpush1.bf16.msra.mxu0 %v5034_v37  ;;  %v4917_v37 = vcombine.high %v92_v26, %v96_v27  ;;  %v184_v9 = vld [vmem:[%s8007_s1 + $0x470] sm:$0xff] }
  0x4f   :  { %1417 = vmatprep.subr.bf16.mxu0 %v5027_v42  ;;  %v4916_v42 = vcombine.low %v92_v26, %v96_v27  ;;  %v44_v12 = vld [vmem:[%s8007_s1 + $0x10] sm:$0xff] }
  0x50   :  { %1389 = vmatpush2.bf16.msra.mxu1 %v4978_v41  ;;  %v5045_v41 = vcombine.high %v220_v30, %v224_v31  ;;  %v48_v13 = vld [vmem:[%s8007_s1 + $0x30] sm:$0xff] }
  0x51   :  { %1390 = vmatprep.subr.bf16.mxu1 %v4971_v45  ;;  %v5044_v45 = vcombine.low %v220_v30, %v224_v31  ;;  %v172_v16 = vld [vmem:[%s8007_s1 + $0x410] sm:$0xff] }
  0x52   :  { %1418 = vmatpush1.bf16.msra.mxu0 %v5026_v46  ;;  %v4909_v46 = vcombine.high %v84_v34, %v88_v35  ;;  %v176_v18 = vld [vmem:[%s8007_s1 + $0x430] sm:$0xff] }
  0x53   :  { %1419 = vmatprep.subr.bf16.mxu0 %v5019_v50  ;;  %v4908_v50 = vcombine.low %v84_v34, %v88_v35  ;;  %v164_v21 = vld [vmem:[%s8007_s1 + $0x3d0] sm:$0xff]  ;;  %v101_v35 = vld [vmem:[%s8007_s1 + $0x1d8] sm:$0xff] }
  0x54   :  { %1391 = vmatpush2.bf16.msra.mxu1 %v4970_v49  ;;  %v5037_v49 = vcombine.high %v212_v39, %v216_v40  ;;  %v168_v22 = vld [vmem:[%s8007_s1 + $0x3f0] sm:$0xff] }
  0x55   :  { %1392 = vmatprep.subr.bf16.mxu1 %v4963_v53  ;;  %v5029_v53 = vcombine.high %v204_v47, %v208_v48  ;;  %v236_v26 = vld [vmem:[%s8007_s1 + $0x610] sm:$0xff] }
  0x56   :  { %1420 = vmatpush1.bf16.msra.mxu0 %v5018_v54  ;;  %v68_v54 = vld [vmem:[%s8007_s1 + $0xd0] sm:$0xff] }
  0x57   :  { %1421 = vmatprep.subr.bf16.mxu0 %v5011_v58  ;;  %v4900_v58 = vcombine.low %v76_v43, %v80_v44  ;;  %v240_v27 = vld [vmem:[%s8007_s1 + $0x630] sm:$0xff]  ;;  %v93_v44 = vld [vmem:[%s8007_s1 + $0x198] sm:$0xff] }
  0x58   :  { %1393 = vmatpush2.bf16.msra.mxu1 %v4962_v57  ;;  %v200_v57 = vld [vmem:[%s8007_s1 + $0x4f0] sm:$0xff]  ;;  %v5061_v34 = vcombine.high %v236_v26, %v240_v27 }
  0x59   :  { %1394 = vmatprep.subr.bf16.mxu1 %v4955_v62  ;;  %v5028_v62 = vcombine.low %v204_v47, %v208_v48  ;;  %v156_v30 = vld [vmem:[%s8007_s1 + $0x390] sm:$0xff] }
  0x5a   :  { %1422 = vmatpush1.bf16.msra.mxu0 %v5010_v63  ;;  %v4893_v63 = vcombine.high %v68_v54, %v72_v55  ;;  %v160_v31 = vld [vmem:[%s8007_s1 + $0x3b0] sm:$0xff] }
  0x5b   :  { %1423 = vmatprep.subr.bf16.mxu0 %v5003_v3  ;;  %v4892_v3 = vcombine.low %v68_v54, %v72_v55  ;;  %v148_v39 = vld [vmem:[%s8007_s1 + $0x350] sm:$0xff] }
  0x5c   :  { %1395 = vmatpush2.bf16.msra.mxu1 %v4954_v2  ;;  %v5021_v2 = vcombine.high %v196_v56, %v200_v57  ;;  %v152_v40 = vld [vmem:[%s8007_s1 + $0x370] sm:$0xff] }
  0x5d   :  { %1396 = vmatprep.subr.bf16.mxu1 %v4947_v6  ;;  %v5020_v6 = vcombine.low %v196_v56, %v200_v57  ;;  %v140_v47 = vld [vmem:[%s8007_s1 + $0x310] sm:$0xff]  ;;  %v4972_v54 = vcombine.low %v148_v39, %v152_v40 }
  0x5e   :  { %1424 = vmatpush1.bf16.msra.mxu0 %v5002_v7  ;;  %v4885_v7 = vcombine.high %v60_v59, %v64_v60  ;;  %v144_v48 = vld [vmem:[%s8007_s1 + $0x330] sm:$0xff] }
  0x5f   :  { %1425 = vmatprep.subr.bf16.mxu0 %v4995_v11  ;;  %v4884_v11 = vcombine.low %v60_v59, %v64_v60  ;;  %v132_v55 = vld [vmem:[%s8007_s1 + $0x2d0] sm:$0xff]  ;;  %v77_v60 = vld [vmem:[%s8007_s1 + $0x118] sm:$0xff] }
  0x60   :  { %1397 = vmatpush2.bf16.msra.mxu1 %v4946_v10  ;;  %v5013_v10 = vcombine.high %v188_v0, %v192_v1  ;;  %v136_v56 = vld [vmem:[%s8007_s1 + $0x2f0] sm:$0xff] }
  0x61   :  { %1398 = vmatprep.subr.bf16.mxu1 %v4939_v14  ;;  %v5012_v14 = vcombine.low %v188_v0, %v192_v1  ;;  %v4957_v1 = vcombine.high %v132_v55, %v136_v56 }
  0x62   :  { %1426 = vmatpush1.bf16.msra.mxu0 %v4994_v15  ;;  %v4877_v15 = vcombine.high %v52_v4, %v56_v5 }
  0x63   :  { %1441 = vmatprep.subr.bf16.mxu0 %v5059_v20  ;;  %v4876_v20 = vcombine.low %v52_v4, %v56_v5  ;;  %v73_v5 = vld [vmem:[%s8007_s1 + $0xf8] sm:$0xff] }
  0x64   :  { %1399 = vmatpush2.bf16.msra.mxu1 %v4938_v19  ;;  %v5005_v19 = vcombine.high %v180_v8, %v184_v9 }
  0x65   :  { %1400 = vmatprep.subr.bf16.mxu1 %v4931_v24  ;;  %v5004_v24 = vcombine.low %v180_v8, %v184_v9  ;;  %v120_v8 = vld [vmem:[%s8007_s1 + $0x270] sm:$0xff] }
  0x66   :  { %1442 = vmatpush2.bf16.msra.mxu0 %v5058_v25  ;;  %v4869_v25 = vcombine.high %v44_v12, %v48_v13 }
  0x67   :  { %1452 = vmatprep.subr.bf16.mxu0 %v4925_v29  ;;  %v4868_v29 = vcombine.low %v44_v12, %v48_v13  ;;  %v65_v12 = vld [vmem:[%s8007_s1 + $0xb8] sm:$0xff] }
  0x68   :  { %1401 = vmatpush2.bf16.msra.mxu1 %v4930_v28  ;;  %v4997_v28 = vcombine.high %v172_v16, %v176_v18 }
  0x69   :  { %1493 = vmatprep.subr.bf16.mxu1 %v5053_v32  ;;  %1444 = vmatmul.mubr.bf16.vlgmr.msra.gmra.mxu0 %v6237_v23  ;;  %v4996_v32 = vcombine.low %v172_v16, %v176_v18  ;;  %v112_v16 = vld [vmem:[%s8007_s1 + $0x230] sm:$0xff] }
  0x6a   :  { %1453 = vmatpush1.bf16.msra.mxu0 %v4924_v33  ;;  %1484 = vmatprep.mubr.bf16.mxu0 %v6195_v61  ;;  %v4989_v33 = vcombine.high %v164_v21, %v168_v22 }
  0x6b   :  { %1403 = vmatmul.mubr.bf16.vlgmr.msra.gmra.mxu1 %v6322_v17  ;;  %1454 = vmatprep.subr.bf16.mxu0 %v4917_v37  ;;  %v4988_v37 = vcombine.low %v164_v21, %v168_v22  ;;  %v57_v21 = vld [vmem:[%s8007_s1 + $0x78] sm:$0xff] }
  0x6c   :  { %1494 = vmatpush1.bf16.msra.mxu1 %v5052_v36  ;;  %5066 = vmatprep.mubr.msk.bf16.mxu1 %vm1284_vm0, %v6152_v38  ;;  %v105_v36 = vld [vmem:[%s8007_s1 + $0x1f8] sm:$0xff] }
  0x6d   :  { %1495 = vmatprep.subr.bf16.mxu1 %v5045_v41  ;;  %v5060_v41 = vcombine.low %v236_v26, %v240_v27  ;;  %v4927_v43 = vcombine.high %v101_v35, %v105_v36  ;;  %v233_v26 = vld [vmem:[%s8007_s1 + $0x5f8] sm:$0xff] }
  0x6e   :  { %1455 = vmatpush1.bf16.msra.mxu0 %v4916_v42  ;;  %v4981_v42 = vcombine.high %v156_v30, %v160_v31 }
  0x6f   :  { %1456 = vmatprep.subr.bf16.mxu0 %v4909_v46  ;;  %v4980_v46 = vcombine.low %v156_v30, %v160_v31  ;;  %v49_v30 = vld [vmem:[%s8007_s1 + $0x38] sm:$0xff] }
  0x70   :  { %1496 = vmatpush1.bf16.msra.mxu1 %v5044_v45  ;;  %v97_v45 = vld [vmem:[%s8007_s1 + $0x1b8] sm:$0xff] }
  0x71   :  { %1497 = vmatprep.subr.bf16.mxu1 %v5037_v49  ;;  %v4926_v49 = vcombine.low %v101_v35, %v105_v36  ;;  %v4918_v57 = vcombine.low %v93_v44, %v97_v45 }
  0x72   :  { %1457 = vmatpush1.bf16.msra.mxu0 %v4908_v50  ;;  %v4973_v50 = vcombine.high %v148_v39, %v152_v40  ;;  %v169_v39 = vld [vmem:[%s8007_s1 + $0x3f8] sm:$0xff] }
  0x73   :  { %1458 = vmatprep.subr.bf16.mxu0 %v4901_v52  ;;  %v85_v52 = vld [vmem:[%s8007_s1 + $0x158] sm:$0xff] }
  0x74   :  { %1498 = vmatpush1.bf16.msra.mxu1 %v5036_v51  ;;  %v4919_v51 = vcombine.high %v93_v44, %v97_v45  ;;  %v157_v45 = vld [vmem:[%s8007_s1 + $0x398] sm:$0xff] }
  0x75   :  { %1499 = vmatprep.subr.bf16.mxu1 %v5029_v53  ;;  %v89_v53 = vld [vmem:[%s8007_s1 + $0x178] sm:$0xff] }
  0x76   :  { %1459 = vmatpush1.bf16.msra.mxu0 %v4900_v58  ;;  %v4965_v58 = vcombine.high %v140_v47, %v144_v48  ;;  %v4911_v59 = vcombine.high %v85_v52, %v89_v53  ;;  %v4910_v0 = vcombine.low %v85_v52, %v89_v53  ;;  %v149_v53 = vld [vmem:[%s8007_s1 + $0x358] sm:$0xff] }
  0x77   :  { %1460 = vmatprep.subr.bf16.mxu0 %v4893_v63  ;;  %v4964_v63 = vcombine.low %v140_v47, %v144_v48  ;;  %v217_v47 = vld [vmem:[%s8007_s1 + $0x578] sm:$0xff] }
  0x78   :  { %1500 = vmatpush1.bf16.msra.mxu1 %v5028_v62  ;;  %v81_v62 = vld [vmem:[%s8007_s1 + $0x138] sm:$0xff] }
  0x79   :  { %1501 = vmatprep.subr.bf16.mxu1 %v5021_v2  ;;  %v124_v2 = vld [vmem:[%s8007_s1 + $0x290] sm:$0xff]  ;;  %v4903_v4 = vcombine.high %v77_v60, %v81_v62  ;;  %v4902_v9 = vcombine.low %v77_v60, %v81_v62  ;;  %v161_v48 = vld [vmem:[%s8007_s1 + $0x3b8] sm:$0xff] }
  0x7a   :  { %1461 = vmatpush1.bf16.msra.mxu0 %v4892_v3  ;;  %v69_v3 = vld [vmem:[%s8007_s1 + $0xd8] sm:$0xff] }
  0x7b   :  { %1462 = vmatprep.subr.bf16.mxu0 %v4885_v7  ;;  %v116_v7 = vld [vmem:[%s8007_s1 + $0x250] sm:$0xff]  ;;  %v4895_v13 = vcombine.high %v69_v3, %v73_v5  ;;  %v4894_v18 = vcombine.low %v69_v3, %v73_v5  ;;  %v141_v60 = vld [vmem:[%s8007_s1 + $0x318] sm:$0xff] }
  0x7c   :  { %1502 = vmatpush1.bf16.msra.mxu1 %v5020_v6  ;;  %v4956_v6 = vcombine.low %v132_v55, %v136_v56  ;;  %v209_v55 = vld [vmem:[%s8007_s1 + $0x538] sm:$0xff] }
  0x7d   :  { %1503 = vmatprep.subr.bf16.mxu1 %v5013_v10  ;;  %v153_v56 = vld [vmem:[%s8007_s1 + $0x378] sm:$0xff] }
  0x7e   :  { %1463 = vmatpush1.bf16.msra.mxu0 %v4884_v11  ;;  %v61_v11 = vld [vmem:[%s8007_s1 + $0x98] sm:$0xff]  ;;  %v4975_v62 = vcombine.high %v149_v53, %v153_v56  ;;  %v4974_v3 = vcombine.low %v149_v53, %v153_v56 }
  0x7f   :  { %1464 = vmatprep.subr.bf16.mxu0 %v4877_v15  ;;  %v108_v15 = vld [vmem:[%s8007_s1 + $0x210] sm:$0xff]  ;;  %v4887_v22 = vcombine.high %v61_v11, %v65_v12  ;;  %v4886_v27 = vcombine.low %v61_v11, %v65_v12  ;;  %v133_v5 = vld [vmem:[%s8007_s1 + $0x2d8] sm:$0xff] }
  0x80   :  { %1504 = vmatpush1.bf16.msra.mxu1 %v5012_v14 }
  0x81   :  { %1505 = vmatprep.subr.bf16.mxu1 %v5005_v19  ;;  %v4941_v19 = vcombine.high %v116_v7, %v120_v8 }
  0x82   :  { %1465 = vmatpush1.bf16.msra.mxu0 %v4876_v20  ;;  %v53_v20 = vld [vmem:[%s8007_s1 + $0x58] sm:$0xff] }
  0x83   :  { %1466 = vmatprep.subr.bf16.mxu0 %v4869_v25  ;;  %v229_v25 = vld [vmem:[%s8007_s1 + $0x5d8] sm:$0xff]  ;;  %v4879_v31 = vcombine.high %v53_v20, %v57_v21  ;;  %v4878_v35 = vcombine.low %v53_v20, %v57_v21 }
  0x84   :  { %1506 = vmatpush1.bf16.msra.mxu1 %v5004_v24  ;;  %v4940_v24 = vcombine.low %v116_v7, %v120_v8  ;;  %v5055_v36 = vcombine.high %v229_v25, %v233_v26 }
  0x85   :  { %1507 = vmatprep.subr.bf16.mxu1 %v4997_v28  ;;  %v4933_v28 = vcombine.high %v108_v15, %v112_v16 }
  0x86   :  { %1467 = vmatpush1.bf16.msra.mxu0 %v4868_v29  ;;  %v45_v29 = vld [vmem:[%s8007_s1 + $0x18] sm:$0xff] }
  0x87   :  { %1468 = vmatprep.subr.bf16.mxu0 %v4989_v33  ;;  %v221_v33 = vld [vmem:[%s8007_s1 + $0x598] sm:$0xff]  ;;  %v4871_v40 = vcombine.high %v45_v29, %v49_v30 }
  0x88   :  { %1508 = vmatpush1.bf16.msra.mxu1 %v4996_v32  ;;  %v4932_v32 = vcombine.low %v108_v15, %v112_v16 }
  0x89   :  { %1523 = vmatprep.subr.bf16.mxu1 %v5061_v34  ;;  %v225_v34 = vld [vmem:[%s8007_s1 + $0x5b8] sm:$0xff] }
  0x8a   :  { %1469 = vmatpush2.bf16.msra.mxu0 %v4988_v37  ;;  %v165_v37 = vld [vmem:[%s8007_s1 + $0x3d8] sm:$0xff]  ;;  %v5047_v44 = vcombine.high %v221_v33, %v225_v34 }
  0x8b   :  { %1470 = vmatprep.subr.bf16.mxu0 %v4981_v42  ;;  %v213_v42 = vld [vmem:[%s8007_s1 + $0x558] sm:$0xff] }
  0x8c   :  { %1524 = vmatpush2.bf16.msra.mxu1 %v5060_v41  ;;  %v5054_v41 = vcombine.low %v229_v25, %v233_v26  ;;  %v5039_v52 = vcombine.high %v213_v42, %v217_v47 }
  0x8d   :  { %1534 = vmatprep.subr.bf16.mxu1 %v4927_v43  ;;  %v4870_v43 = vcombine.low %v45_v29, %v49_v30 }
  0x8e   :  { %1471 = vmatpush2.bf16.msra.mxu0 %v4980_v46  ;;  %v4991_v46 = vcombine.high %v165_v37, %v169_v39 }
  0x8f   :  { %1526 = vmatmul.mubr.bf16.vlgmr.msra.gmra.mxu1 %v6237_v23  ;;  %1472 = vmatprep.subr.bf16.mxu0 %v4973_v50  ;;  %v205_v50 = vld [vmem:[%s8007_s1 + $0x518] sm:$0xff] }
  0x90   :  { %1535 = vmatpush1.bf16.msra.mxu1 %v4926_v49  ;;  %1566 = vmatprep.mubr.bf16.mxu1 %v6195_v61  ;;  %v128_v61 = vld [vmem:[%s8007_s1 + $0x2b0] sm:$0xff]  ;;  %v5046_v49 = vcombine.low %v221_v33, %v225_v34 }
  0x91   :  { %1536 = vmatprep.subr.bf16.mxu1 %v4919_v51  ;;  %v4949_v10 = vcombine.high %v124_v2, %v128_v61  ;;  %v4948_v14 = vcombine.low %v124_v2, %v128_v61  ;;  %v4990_v51 = vcombine.low %v165_v37, %v169_v39  ;;  %v189_v2 = vld [vmem:[%s8007_s1 + $0x498] sm:$0xff] }
  0x92   :  { %1473 = vmatpush2.bf16.msra.mxu0 %v4972_v54  ;;  %v4983_v54 = vcombine.high %v157_v45, %v161_v48  ;;  %v193_v61 = vld [vmem:[%s8007_s1 + $0x4b8] sm:$0xff] }
  0x93   :  { %1474 = vmatprep.subr.bf16.mxu0 %v4965_v58  ;;  %v4982_v58 = vcombine.low %v157_v45, %v161_v48  ;;  %v5015_v12 = vcombine.high %v189_v2, %v193_v61  ;;  %v5014_v16 = vcombine.low %v189_v2, %v193_v61  ;;  %v5551_v39 = vld [vmem:[%s8009_s3 + $0x78] sm:$0xff]   ;;  %v5555_v48 = vld [vmem:[%s8009_s3 + $0x68] sm:$0xff]  }
  0x94   :  { %1537 = vmatpush1.bf16.msra.mxu1 %v4918_v57  ;;  %v197_v57 = vld [vmem:[%s8007_s1 + $0x4d8] sm:$0xff] }
  0x95   :  { %1538 = vmatprep.subr.bf16.mxu1 %v4911_v59  ;;  %v5031_v59 = vcombine.high %v205_v50, %v209_v55  ;;  %v5568_v45 = vld [vmem:[%s8009_s3 + $0xb8] sm:$0xff]  }
  0x96   :  { %1475 = vmatpush2.bf16.msra.mxu0 %v4964_v63  ;;  %v201_v63 = vld [vmem:[%s8007_s1 + $0x4f8] sm:$0xff] }
  0x97   :  { %1476 = vmatprep.subr.bf16.mxu0 %v4957_v1  ;;  %v5030_v1 = vcombine.low %v205_v50, %v209_v55  ;;  %v5022_v8 = vcombine.low %v197_v57, %v201_v63  ;;  %v5571_v50 = vld [vmem:[%s8009_s3 + $0xe8] sm:$0xff]  }
  0x98   :  { %1539 = vmatpush1.bf16.msra.mxu1 %v4910_v0  ;;  %v145_v0 = vld [vmem:[%s8007_s1 + $0x338] sm:$0xff] }
  0x99   :  { %1540 = vmatprep.subr.bf16.mxu1 %v4903_v4  ;;  %v5023_v4 = vcombine.high %v197_v57, %v201_v63  ;;  %v4967_v7 = vcombine.high %v141_v60, %v145_v0  ;;  %v4966_v11 = vcombine.low %v141_v60, %v145_v0 }
  0x9a   :  { %1477 = vmatpush2.bf16.msra.mxu0 %v4956_v6  ;;  %v137_v6 = vld [vmem:[%s8007_s1 + $0x2f8] sm:$0xff] }
  0x9b   :  { %1478 = vmatprep.subr.bf16.mxu0 %v4949_v10  ;;  %v185_v10 = vld [vmem:[%s8007_s1 + $0x478] sm:$0xff]  ;;  %v4959_v15 = vcombine.high %v133_v5, %v137_v6  ;;  %v4958_v20 = vcombine.low %v133_v5, %v137_v6 }
  0x9c   :  { %1541 = vmatpush1.bf16.msra.mxu1 %v4902_v9  ;;  %v181_v9 = vld [vmem:[%s8007_s1 + $0x458] sm:$0xff] }
  0x9d   :  { %1542 = vmatprep.subr.bf16.mxu1 %v4895_v13  ;;  %v125_v13 = vld [vmem:[%s8007_s1 + $0x298] sm:$0xff]  ;;  %v5007_v21 = vcombine.high %v181_v9, %v185_v10  ;;  %v5006_v26 = vcombine.low %v181_v9, %v185_v10 }
  0x9e   :  { %1479 = vmatpush2.bf16.msra.mxu0 %v4948_v14  ;;  %v129_v14 = vld [vmem:[%s8007_s1 + $0x2b8] sm:$0xff] }
  0x9f   :  { %1480 = vmatprep.subr.bf16.mxu0 %v4941_v19  ;;  %v177_v19 = vld [vmem:[%s8007_s1 + $0x438] sm:$0xff]  ;;  %v4951_v25 = vcombine.high %v125_v13, %v129_v14  ;;  %v4950_v29 = vcombine.low %v125_v13, %v129_v14 }
  0xa0   :  { %1543 = vmatpush1.bf16.msra.mxu1 %v4894_v18  ;;  %v173_v18 = vld [vmem:[%s8007_s1 + $0x418] sm:$0xff] }
  0xa1   :  { %1544 = vmatprep.subr.bf16.mxu1 %v4887_v22  ;;  %v117_v22 = vld [vmem:[%s8007_s1 + $0x258] sm:$0xff]  ;;  %v4999_v30 = vcombine.high %v173_v18, %v177_v19  ;;  %v4998_v34 = vcombine.low %v173_v18, %v177_v19 }
  0xa2   :  { %1481 = vmatpush2.bf16.msra.mxu0 %v4940_v24  ;;  %v121_v24 = vld [vmem:[%s8007_s1 + $0x278] sm:$0xff] }
  0xa3   :  { %1482 = vmatprep.subr.bf16.mxu0 %v4933_v28  ;;  %v241_v28 = vld [vmem:[%s8007_s1 + $0x638] sm:$0xff]  ;;  %v4943_v33 = vcombine.high %v117_v22, %v121_v24 }
  0xa4   :  { %1545 = vmatpush1.bf16.msra.mxu1 %v4886_v27  ;;  %v237_v27 = vld [vmem:[%s8007_s1 + $0x618] sm:$0xff] }
  0xa5   :  { %1546 = vmatprep.subr.bf16.mxu1 %v4879_v31  ;;  %v109_v31 = vld [vmem:[%s8007_s1 + $0x218] sm:$0xff] }
  0xa6   :  { %1483 = vmatpush2.bf16.msra.mxu0 %v4932_v32  ;;  %v113_v32 = vld [vmem:[%s8007_s1 + $0x238] sm:$0xff] }
  0xa7   :  { %1575 = vmatprep.subr.bf16.mxu0 %v5055_v36  ;;  %v5063_v36 = vcombine.high %v237_v27, %v241_v28  ;;  %v4935_v37 = vcombine.high %v109_v31, %v113_v32 }
  0xa8   :  { %1547 = vmatpush1.bf16.msra.mxu1 %v4878_v35  ;;  %v4942_v35 = vcombine.low %v117_v22, %v121_v24 }
  0xa9   :  { %1548 = vmatprep.subr.bf16.mxu1 %v4871_v40  ;;  %1485 = vmatmul.mubr.bf16.vlgmr.msra.gmra.mxu0 %v6322_v17  ;;  %v5062_v40 = vcombine.low %v237_v27, %v241_v28 }
  0xaa   :  { %1576 = vmatpush1.bf16.msra.mxu0 %v5054_v41  ;;  %5067 = vmatprep.mubr.msk.bf16.mxu0 %vm1284_vm0, %v6152_v38  ;;  %v5038_v38 = vcombine.low %v213_v42, %v217_v47  ;;  %v5567_v41 = vld [vmem:[%s8009_s3 + $0xf8] sm:$0xff]   ;;  %v4934_v42 = vcombine.low %v109_v31, %v113_v32  ;;  %v5554_v47 = vld [vmem:[%s8009_s3 + $0x30] sm:$0xff]  }
  0xab   :  { %1577 = vmatprep.subr.bf16.mxu0 %v5047_v44  ;;  %v5553_v44 = vld [vmem:[%s8009_s3 + $0x70] sm:$0xff]  }
  0xac   :  { %1549 = vmatpush1.bf16.msra.mxu1 %v4870_v43  ;;  %v5552_v43 = vld [vmem:[%s8009_s3 + $0x38] sm:$0xff]  }
  0xad   :  { %1550 = vmatprep.subr.bf16.mxu1 %v4991_v46  ;;  %v5569_v46 = vld [vmem:[%s8009_s3 + $0xf0] sm:$0xff]  }
  0xae   :  { %1578 = vmatpush1.bf16.msra.mxu0 %v5046_v49  ;;  %v5570_v49 = vld [vmem:[%s8009_s3 + $0xb0] sm:$0xff]  }
  0xaf   :  { %1579 = vmatprep.subr.bf16.mxu0 %v5039_v52 }
  0xb0   :  { %1551 = vmatpush2.bf16.msra.mxu1 %v4990_v51 }
  0xb1   :  { %1552 = vmatprep.subr.bf16.mxu1 %v4983_v54 }
  0xb2   :  { %1580 = vmatpush1.bf16.msra.mxu0 %v5038_v38 }
  0xb3   :  { %1581 = vmatprep.subr.bf16.mxu0 %v5031_v59 }
  0xb4   :  { %1553 = vmatpush2.bf16.msra.mxu1 %v4982_v58 }
  0xb5   :  { %1554 = vmatprep.subr.bf16.mxu1 %v4975_v62 }
  0xb6   :  { %1582 = vmatpush1.bf16.msra.mxu0 %v5030_v1 }
  0xb7   :  { %1583 = vmatprep.subr.bf16.mxu0 %v5023_v4 }
  0xb8   :  { %1555 = vmatpush2.bf16.msra.mxu1 %v4974_v3 }
  0xb9   :  { %1556 = vmatprep.subr.bf16.mxu1 %v4967_v7 }
  0xba   :  { %1584 = vmatpush1.bf16.msra.mxu0 %v5022_v8 }
  0xbb   :  { %1585 = vmatprep.subr.bf16.mxu0 %v5015_v12 }
  0xbc   :  { %1557 = vmatpush2.bf16.msra.mxu1 %v4966_v11 }
  0xbd   :  { %1558 = vmatprep.subr.bf16.mxu1 %v4959_v15 }
  0xbe   :  { %1586 = vmatpush1.bf16.msra.mxu0 %v5014_v16 }
  0xbf   :  { %1587 = vmatprep.subr.bf16.mxu0 %v5007_v21 }
  0xc0   :  { %1559 = vmatpush2.bf16.msra.mxu1 %v4958_v20 }
  0xc1   :  { %1560 = vmatprep.subr.bf16.mxu1 %v4951_v25 }
  0xc2   :  { %1588 = vmatpush1.bf16.msra.mxu0 %v5006_v26 }
  0xc3   :  { %1589 = vmatprep.subr.bf16.mxu0 %v4999_v30 }
  0xc4   :  { %1561 = vmatpush2.bf16.msra.mxu1 %v4950_v29 }
  0xc5   :  { %1562 = vmatprep.subr.bf16.mxu1 %v4943_v33 }
  0xc6   :  { %1590 = vmatpush1.bf16.msra.mxu0 %v4998_v34 }
  0xc7   :  { %1605 = vmatprep.subr.bf16.mxu0 %v5063_v36 }
  0xc8   :  { %1563 = vmatpush2.bf16.msra.mxu1 %v4942_v35 }
  0xc9   :  { %1564 = vmatprep.subr.bf16.mxu1 %v4935_v37 }
  0xca   :  { %1606 = vmatpush2.bf16.msra.mxu0 %v5062_v40 }
  0xcb   :  { %5461 = vmatprep.subr.bf16.mxu0 %v5551_v39 }
  0xcc   :  { %1565 = vmatpush2.bf16.msra.mxu1 %v4934_v42 }
  0xcd   :  { %5483 = vmatprep.subr.bf16.mxu1 %v5567_v41  ;;  %1608 = vmatmul.mubr.bf16.vlgmr.msra.gmra.mxu0 %v6237_v23 }
  0xce   :  { %5462 = vmatpush3.bf16.msra.mxu0 %v5552_v43 }
  0xcf   :  { %1567 = vmatmul.mubr.bf16.vlgmr.msra.gmra.mxu1 %v6322_v17  ;;  %5463 = vmatprep.subr.bf16.mxu0 %v5553_v44 }
  0xd0   :  { %5484 = vmatpush3.bf16.msra.mxu1 %v5568_v45 }
  0xd1   :  { %5485 = vmatprep.subr.bf16.mxu1 %v5569_v46 }
  0xd2   :  { %14 = vsyncpa [#allocation3], 0  ;;  %5464 = vmatpush3.bf16.msra.mxu0 %v5554_v47  ;;  %v5556_v23 = vld [vmem:[%s8009_s3 + $0x28] sm:$0xff]   ;;  %v5557_v51 = vld [vmem:[%s8009_s3 + $0x60] sm:$0xff]   ;;  %v244_v12 = vlaneseq  ;;  %vm4846_vm1 = vcmask 1043456   ;;  %vm4847_vm2 = vcmask 130052  }
  0xd3   :  { %5465 = vmatprep.subr.bf16.mxu0 %v5555_v48  ;;  %v5572_v17 = vld [vmem:[%s8009_s3 + $0xa8] sm:$0xff]   ;;  %v5573_v52 = vld [vmem:[%s8009_s3 + $0xe0] sm:$0xff]   ;;  %v5559_v54 = vld [vmem:[%s8009_s3 + $0x58] sm:$0xff]  }
  0xd4   :  { %5486 = vmatpush3.bf16.msra.mxu1 %v5570_v49  ;;  %v5558_v53 = vld [vmem:[%s8009_s3 + $0x20] sm:$0xff]   ;;  %v5575_v56 = vld [vmem:[%s8009_s3 + $0xd8] sm:$0xff]   ;;  %v5561_v57 = vld [vmem:[%s8009_s3 + $0x50] sm:$0xff]   ;;  %v6831_v13 = vshrl.u32 %v244_v12, 7 }
  0xd5   :  { %5487 = vmatprep.subr.bf16.mxu1 %v5571_v50  ;;  %v5574_v55 = vld [vmem:[%s8009_s3 + $0xa0] sm:$0xff]   ;;  %v5560_v38 = vld [vmem:[%s8009_s3 + $0x18] sm:$0xff]   ;;  %v5577_v59 = vld [vmem:[%s8009_s3 + $0xd0] sm:$0xff]  }
  0xd6   :  { %5466 = vmatpush3.bf16.msra.mxu0 %v5556_v23  ;;  %v5576_v58 = vld [vmem:[%s8009_s3 + $0x98] sm:$0xff]   ;;  %v5562_v60 = vld [vmem:[%s8009_s3 + $0x10] sm:$0xff]   ;;  %v5563_v62 = vld [vmem:[%s8009_s3 + $0x48] sm:$0xff]   ;;  %v6834_v14 = vsub.s32 0, %v6831_v13  ;;  %v6842_v16 = vsub.s32 1, %v6831_v13  ;;  %v6882_v45 = vsub.s32 2, %v6831_v13 }
  0xd7   :  { %5467 = vmatprep.subr.bf16.mxu0 %v5557_v51  ;;  %v5578_v63 = vld [vmem:[%s8009_s3 + $0x90] sm:$0xff]   ;;  %v5579_v0 = vld [vmem:[%s8009_s3 + $0xc8] sm:$0xff]   ;;  %v5565_v2 = vld [vmem:[%s8009_s3 + $0x40] sm:$0xff]   ;;  %v6888_v47 = vsub.s32 3, %v6831_v13 }
  0xd8   :  { %5488 = vmatpush3.bf16.msra.mxu1 %v5572_v17  ;;  %v5564_v1 = vld [vmem:[%s8009_s3 + $0x8] sm:$0xff]   ;;  %v5581_v3 = vld [vmem:[%s8009_s3 + $0xc0] sm:$0xff]   ;;  %v5583_v6 = vld [vmem:[%s8009_s3 + $0x178] sm:$0xff]  }
  0xd9   :  { %5489 = vmatprep.subr.bf16.mxu1 %v5573_v52  ;;  %v5580_v61 = vld [vmem:[%s8009_s3 + $0x88] sm:$0xff]   ;;  %v5566_v4 = vld [vmem:[%s8009_s3] sm:$0xff]   ;;  %v5599_v11 = vld [vmem:[%s8009_s3 + $0x1f8] sm:$0xff]  }
  0xda   :  { %5468 = vmatpush3.bf16.msra.mxu0 %v5558_v53  ;;  %v5582_v5 = vld [vmem:[%s8009_s3 + $0x80] sm:$0xff]   ;;  %v5584_v32 = vld [vmem:[%s8009_s3 + $0x138] sm:$0xff]   ;;  %v5585_v34 = vld [vmem:[%s8009_s3 + $0x170] sm:$0xff]  }
  0xdb   :  { %5469 = vmatprep.subr.bf16.mxu0 %v5559_v54  ;;  %v6839_v15 = vld [vmem:[%s8008_s2] sm:$0xff]  ;;  %v5586_v35 = vld [vmem:[%s8009_s3 + $0x130] sm:$0xff]   ;;  %v5587_v36 = vld [vmem:[%s8009_s3 + $0x168] sm:$0xff]  }
  0xdc   :  { %5490 = vmatpush3.bf16.msra.mxu1 %v5574_v55  ;;  %v247_v18 = vrot.slane %v6839_v15, %v6834_v14  ;;  %v251_v19 = vrot.slane %v6839_v15, %v6842_v16  ;;  %v5588_v37 = vld [vmem:[%s8009_s3 + $0x128] sm:$0xff]   ;;  %v5589_v39 = vld [vmem:[%s8009_s3 + $0x160] sm:$0xff]   ;;  %v5591_v41 = vld [vmem:[%s8009_s3 + $0x158] sm:$0xff]   ;;  %v255_v49 = vrot.slane %v6839_v15, %v6882_v45  ;;  %v259_v51 = vrot.slane %v6839_v15, %v6888_v47 }
  0xdd   :  { %5491 = vmatprep.subr.bf16.mxu1 %v5575_v56  ;;  %v5590_v40 = vld [vmem:[%s8009_s3 + $0x120] sm:$0xff]   ;;  %v5592_v42 = vld [vmem:[%s8009_s3 + $0x118] sm:$0xff]   ;;  %v5593_v43 = vld [vmem:[%s8009_s3 + $0x150] sm:$0xff]  }
  0xde   :  { %5470 = vmatpush3.bf16.msra.mxu0 %v5560_v38  ;;  %v5594_v44 = vld [vmem:[%s8009_s3 + $0x110] sm:$0xff]   ;;  %v5595_v46 = vld [vmem:[%s8009_s3 + $0x148] sm:$0xff]   ;;  %v5597_v50 = vld [vmem:[%s8009_s3 + $0x140] sm:$0xff]  }
  0xdf   :  { %5471 = vmatprep.subr.bf16.mxu0 %v5561_v57  ;;  %v5596_v48 = vld [vmem:[%s8009_s3 + $0x108] sm:$0xff]   ;;  %v5598_v52 = vld [vmem:[%s8009_s3 + $0x100] sm:$0xff]   ;;  %v5610_v12 = vld [vmem:[%s8009_s3 + $0x190] sm:$0xff]  }
  0xe0   :  { %5492 = vmatpush3.bf16.msra.mxu1 %v5576_v58  ;;  %vm4848_vm3 = vmor %vm4847_vm2, %vm4846_vm1 }
  0xe1   :  { %5493 = vmatprep.subr.bf16.mxu1 %v5577_v59 }
  0xe2   :  { %5472 = vmatpush3.bf16.msra.mxu0 %v5562_v60 }
  0xe3   :  { %5473 = vmatprep.subr.bf16.mxu0 %v5563_v62 }
  0xe4   :  { %5494 = vmatpush3.bf16.msra.mxu1 %v5578_v63 }
  0xe5   :  { %5495 = vmatprep.subr.bf16.mxu1 %v5579_v0 }
  0xe6   :  { %5474 = vmatpush3.bf16.msra.mxu0 %v5564_v1 }
  0xe7   :  { %5475 = vmatprep.subr.bf16.mxu0 %v5565_v2  ;;  %v5600_v2 = vld [vmem:[%s8009_s3 + $0x1b8] sm:$0xff]  }
  0xe8   :  { %5496 = vmatpush3.bf16.msra.mxu1 %v5580_v61 }
  0xe9   :  { %5497 = vmatprep.subr.bf16.mxu1 %v5581_v3  ;;  %v5601_v3 = vld [vmem:[%s8009_s3 + $0x1f0] sm:$0xff]  }
  0xea   :  { %5476 = vmatpush3.bf16.msra.mxu0 %v5566_v4  ;;  %v5602_v4 = vld [vmem:[%s8009_s3 + $0x1b0] sm:$0xff]  }
  0xeb   :  { %v1363_v7 = vpop.f32.mrf.mxu1  ;;  %5505 = vmatprep.subr.bf16.mxu0 %v5583_v6  ;;  %v5604_v6 = vld [vmem:[%s8009_s3 + $0x1a8] sm:$0xff]  }
  0xec   :  { %5498 = vmatpush3.bf16.msra.mxu1 %v5582_v5  ;;  %v5603_v5 = vld [vmem:[%s8009_s3 + $0x1e8] sm:$0xff]  }
  0xed   :  { %v1365_v8 = vpop.f32.mrf.mxu1  ;;  %5527 = vmatprep.subr.bf16.mxu1 %v5599_v11  ;;  %v5609_v11 = vld [vmem:[%s8009_s3 + $0x1d0] sm:$0xff]  }
  0xef   :  { %v1367_v9 = vpop.f32.mrf.mxu1 }
  0xf0   :  { %v5607_v9 = vld [vmem:[%s8009_s3 + $0x1d8] sm:$0xff]  }
  0xf1   :  { %v1368_v10 = vpop.f32.mrf.mxu1 }
  0xf2   :  { %v5608_v10 = vld [vmem:[%s8009_s3 + $0x198] sm:$0xff]  }
 0x105   :  { %v1322_v20 = vpop.f32.mrf.mxu0 }
 0x106   :  { %v1323_v21 = vadd.f32 %v1322_v20, %v247_v18  ;;  %v5611_v18 = vld [vmem:[%s8009_s3 + $0x1c8] sm:$0xff]   ;;  %v5613_v20 = vld [vmem:[%s8009_s3 + $0x1c0] sm:$0xff]  }
 0x107   :  { %v1324_v22 = vpop.f32.mrf.mxu0 }
 0x108   :  { %v1364_v24 = vadd.f32 %v1363_v7, %v1323_v21  ;;  %v1325_v25 = vadd.f32 %v1324_v22, %v251_v19  ;;  %v5605_v7 = vld [vmem:[%s8009_s3 + $0x1e0] sm:$0xff]   ;;  %v5612_v19 = vld [vmem:[%s8009_s3 + $0x188] sm:$0xff]  }
 0x109   :  { %v1326_v26 = vpop.f32.mrf.mxu0  ;;  %v5614_v22 = vld [vmem:[%s8009_s3 + $0x180] sm:$0xff]  }
 0x10a   :  { %v1366_v27 = vadd.f32 %v1365_v8, %v1325_v25  ;;  %v1616_v28 = vmax.f32 %v1364_v24, 0.0  ;;  %v5606_v8 = vld [vmem:[%s8009_s3 + $0x1a0] sm:$0xff]  }
 0x10b   :  { %v1327_v29 = vpop.f32.mrf.mxu0 }
 0x10c   :  { %v1617_v30 = vmax.f32 %v1366_v27, 0.0  ;;  %v1624_v33 = vpack.c.bf16 %v1616_v28, %v1616_v28  ;;  %v262_v27 = vsub.s32 4, %v6831_v13  ;;  %v266_v28 = vsub.s32 5, %v6831_v13 }
 0x10e   :  { %v1625_v31 = vpack.c.bf16 %v1617_v30, %v1617_v30  ;;  %v263_v29 = vrot.slane %v6839_v15, %v262_v27  ;;  %v267_v30 = vrot.slane %v6839_v15, %v266_v28 }
 0x110   :  { %2183 = vmatprep.mubr.bf16.mxu0 %v1625_v31 }
 0x111   :  { %2184 = vmatmul.mubr.bf16.vlgmr.msra.gmra.mxu0 %v1624_v33 }
 0x112   :  { %5506 = vmatpush3.bf16.msra.mxu0 %v5584_v32 }
 0x113   :  { %5507 = vmatprep.subr.bf16.mxu0 %v5585_v34 }
 0x116   :  { %5508 = vmatpush3.bf16.msra.mxu0 %v5586_v35 }
 0x117   :  { %5509 = vmatprep.subr.bf16.mxu0 %v5587_v36 }
 0x11a   :  { %5510 = vmatpush3.bf16.msra.mxu0 %v5588_v37 }
 0x11b   :  { %5511 = vmatprep.subr.bf16.mxu0 %v5589_v39 }
 0x11e   :  { %5512 = vmatpush3.bf16.msra.mxu0 %v5590_v40 }
 0x11f   :  { %5513 = vmatprep.subr.bf16.mxu0 %v5591_v41 }
 0x122   :  { %5514 = vmatpush3.bf16.msra.mxu0 %v5592_v42 }
 0x123   :  { %5515 = vmatprep.subr.bf16.mxu0 %v5593_v43 }
 0x126   :  { %5516 = vmatpush3.bf16.msra.mxu0 %v5594_v44  ;;  %v270_v44 = vsub.s32 6, %v6831_v13 }
 0x127   :  { %5517 = vmatprep.subr.bf16.mxu0 %v5595_v46  ;;  %v274_v46 = vsub.s32 7, %v6831_v13  ;;  %v5798_v13 = vld [vmem:[%s8013_s7 + $0x720] ss:$16 sps:$4 sm:$0xff]  }
 0x129   :  { %v1445_v23 = vpop.f32.mrf.mxu0 }
 0x12a   :  { %5518 = vmatpush3.bf16.msra.mxu0 %v5596_v48  ;;  %v271_v48 = vrot.slane %v6839_v15, %v270_v44 }
 0x12b   :  { %v1404_v17 = vpop.f32.mrf.mxu1  ;;  %v1447_v54 = vpop.f32.mrf.mxu0  ;;  %5519 = vmatprep.subr.bf16.mxu0 %v5597_v50  ;;  %v275_v50 = vrot.slane %v6839_v15, %v274_v46  ;;  %v2369_v15 = vld [vmem:[%s8011_s5 + $0x1c0] sm:$0xff] }
 0x12c   :  { %v1405_v53 = vadd.f32 %v1404_v17, %v255_v49 }
 0x12d   :  { %v1406_v55 = vpop.f32.mrf.mxu1  ;;  %v1449_v57 = vpop.f32.mrf.mxu0 }
 0x12e   :  { %v1446_v56 = vadd.f32 %v1445_v23, %v1405_v53  ;;  %v1407_v38 = vadd.f32 %v1406_v55, %v259_v51  ;;  %5520 = vmatpush3.bf16.msra.mxu0 %v5598_v52 }
 0x12f   :  { %v1408_v58 = vpop.f32.mrf.mxu1  ;;  %v1450_v60 = vpop.f32.mrf.mxu0 }
 0x130   :  { %v1448_v59 = vadd.f32 %v1447_v54, %v1407_v38  ;;  %v1618_v62 = vmax.f32 %v1446_v56, 0.0 }
 0x131   :  { %v1409_v63 = vpop.f32.mrf.mxu1 }
 0x132   :  { %v1619_v0 = vmax.f32 %v1448_v59, 0.0  ;;  %v1626_v61 = vpack.c.bf16 %v1618_v62, %v1618_v62 }
 0x134   :  { %v1627_v1 = vpack.c.bf16 %v1619_v0, %v1619_v0  ;;  %v2373_v0 = vld [vmem:[%s8011_s5 + $0x1e0] sm:$0xff] }
 0x136   :  { %2223 = vmatprep.mubr.bf16.mxu1 %v1627_v1  ;;  %v2370_v1 = vld [vmem:[%s8011_s5 + $0x1c8] sm:$0xff] }
 0x137   :  { %2224 = vmatmul.mubr.bf16.vlgmr.msra.gmra.mxu1 %v1626_v61  ;;  %v5190_v61 = vcombine.high %v2369_v15, %v2373_v0 }
 0x138   :  { %5528 = vmatpush3.bf16.msra.mxu1 %v5600_v2  ;;  %v5189_v2 = vcombine.low %v2369_v15, %v2373_v0  ;;  %v2322_v15 = vld [vmem:[%s8011_s5 + $0x48] sm:$0xff] }
 0x139   :  { %5529 = vmatprep.subr.bf16.mxu1 %v5601_v3  ;;  %v2374_v3 = vld [vmem:[%s8011_s5 + $0x1e8] sm:$0xff]  ;;  %2739 = vmatprep.subr.bf16.mxu0 %v5190_v61 }
 0x13c   :  { %5530 = vmatpush3.bf16.msra.mxu1 %v5602_v4  ;;  %v2361_v4 = vld [vmem:[%s8011_s5 + $0x180] sm:$0xff] }
 0x13d   :  { %5531 = vmatprep.subr.bf16.mxu1 %v5603_v5  ;;  %v2365_v5 = vld [vmem:[%s8011_s5 + $0x1a0] sm:$0xff] }
 0x140   :  { %5532 = vmatpush3.bf16.msra.mxu1 %v5604_v6  ;;  %v5191_v6 = vcombine.low %v2370_v1, %v2374_v3 }
 0x141   :  { %5533 = vmatprep.subr.bf16.mxu1 %v5605_v7  ;;  %v5192_v7 = vcombine.high %v2370_v1, %v2374_v3  ;;  %v2326_v1 = vld [vmem:[%s8011_s5 + $0x68] sm:$0xff] }
 0x142   :  { %v5143_v61 = vcombine.low %v2322_v15, %v2326_v1  ;;  %v5144_v3 = vcombine.high %v2322_v15, %v2326_v1 }
 0x144   :  { %5534 = vmatpush3.bf16.msra.mxu1 %v5606_v8  ;;  %v5182_v8 = vcombine.high %v2361_v4, %v2365_v5 }
 0x145   :  { %5535 = vmatprep.subr.bf16.mxu1 %v5607_v9  ;;  %v2362_v9 = vld [vmem:[%s8011_s5 + $0x188] sm:$0xff] }
 0x148   :  { %5536 = vmatpush3.bf16.msra.mxu1 %v5608_v10  ;;  %v2366_v10 = vld [vmem:[%s8011_s5 + $0x1a8] sm:$0xff] }
 0x149   :  { %5537 = vmatprep.subr.bf16.mxu1 %v5609_v11  ;;  %v2353_v11 = vld [vmem:[%s8011_s5 + $0x140] sm:$0xff] }
 0x14c   :  { %5538 = vmatpush3.bf16.msra.mxu1 %v5610_v12  ;;  %v5184_v12 = vcombine.high %v2362_v9, %v2366_v10 }
 0x14d   :  { %5539 = vmatprep.subr.bf16.mxu1 %v5611_v18  ;;  %v2357_v18 = vld [vmem:[%s8011_s5 + $0x160] sm:$0xff] }
 0x14f   :  { %v1527_v21 = vpop.f32.mrf.mxu1 }
 0x150   :  { %5540 = vmatpush3.bf16.msra.mxu1 %v5612_v19  ;;  %v2354_v19 = vld [vmem:[%s8011_s5 + $0x148] sm:$0xff] }
 0x151   :  { %v1529_v24 = vpop.f32.mrf.mxu1  ;;  %5541 = vmatprep.subr.bf16.mxu1 %v5613_v20  ;;  %v2358_v20 = vld [vmem:[%s8011_s5 + $0x168] sm:$0xff] }
 0x153   :  { %v1531_v25 = vpop.f32.mrf.mxu1 }
 0x154   :  { %5542 = vmatpush3.bf16.msra.mxu1 %v5614_v22  ;;  %v5183_v22 = vcombine.low %v2362_v9, %v2366_v10  ;;  %v5176_v25 = vcombine.high %v2354_v19, %v2358_v20 }
 0x155   :  { %v1532_v26 = vpop.f32.mrf.mxu1  ;;  %2780 = vmatprep.subr.bf16.mxu1 %v5192_v7 }
 0x156   :  { %v2345_v26 = vld [vmem:[%s8011_s5 + $0x100] sm:$0xff] }
 0x169   :  { %v1486_v31 = vpop.f32.mrf.mxu0 }
 0x16a   :  { %v1487_v32 = vadd.f32 %v1486_v31, %v263_v29  ;;  %v2349_v29 = vld [vmem:[%s8011_s5 + $0x120] sm:$0xff]  ;;  %v2350_v31 = vld [vmem:[%s8011_s5 + $0x128] sm:$0xff] }
 0x16b   :  { %v1488_v33 = vpop.f32.mrf.mxu0 }
 0x16c   :  { %v1528_v34 = vadd.f32 %v1527_v21, %v1487_v32  ;;  %v1489_v35 = vadd.f32 %v1488_v33, %v267_v30  ;;  %v5181_v21 = vcombine.low %v2361_v4, %v2365_v5  ;;  %v2346_v30 = vld [vmem:[%s8011_s5 + $0x108] sm:$0xff]  ;;  %v5173_v32 = vcombine.low %v2353_v11, %v2357_v18  ;;  %v2313_v4 = vld [vmem:[%s8011_s5] sm:$0xff] }
 0x16d   :  { %v1490_v36 = vpop.f32.mrf.mxu0  ;;  %v5175_v33 = vcombine.low %v2354_v19, %v2358_v20  ;;  %v2317_v5 = vld [vmem:[%s8011_s5 + $0x20] sm:$0xff]  ;;  %v2372_v19 = vld [vmem:[%s8011_s5 + $0x1d8] sm:$0xff] }
 0x16e   :  { %v1530_v37 = vadd.f32 %v1529_v24, %v1489_v35  ;;  %v1620_v39 = vmax.f32 %v1528_v34, 0.0  ;;  %v5174_v24 = vcombine.high %v2353_v11, %v2357_v18  ;;  %v5166_v34 = vcombine.high %v2345_v26, %v2349_v29  ;;  %v2337_v36 = vld [vmem:[%s8011_s5 + $0xc0] sm:$0xff]  ;;  %v2375_v18 = vld [vmem:[%s8011_s5 + $0x1f0] sm:$0xff] }
 0x16f   :  { %v1491_v40 = vpop.f32.mrf.mxu0  ;;  %v5168_v35 = vcombine.high %v2346_v30, %v2350_v31  ;;  %v5134_v7 = vcombine.high %v2313_v4, %v2317_v5  ;;  %v5133_v9 = vcombine.low %v2313_v4, %v2317_v5  ;;  %v2348_v4 = vld [vmem:[%s8011_s5 + $0x118] sm:$0xff] }
 0x170   :  { %v1621_v41 = vmax.f32 %v1530_v37, 0.0  ;;  %v1628_v43 = vpack.c.bf16 %v1620_v39, %v1620_v39  ;;  %v2341_v37 = vld [vmem:[%s8011_s5 + $0xe0] sm:$0xff]  ;;  %v2338_v39 = vld [vmem:[%s8011_s5 + $0xc8] sm:$0xff]  ;;  %v2352_v5 = vld [vmem:[%s8011_s5 + $0x138] sm:$0xff] }
 0x171   :  { %v2342_v40 = vld [vmem:[%s8011_s5 + $0xe8] sm:$0xff] }
 0x172   :  { %v1629_v42 = vpack.c.bf16 %v1621_v41, %v1621_v41  ;;  %v5165_v41 = vcombine.low %v2345_v26, %v2349_v29  ;;  %v6037_v26 = vmov 0   ;;  %v5068_v29 = vld [vmem:[%s8010_s4] ss:$0 sm:$0xff] }
 0x174   :  { %2263 = vmatprep.mubr.bf16.mxu0 %v1629_v42  ;;  %v5167_v42 = vcombine.low %v2346_v30, %v2350_v31 }
 0x175   :  { %2264 = vmatmul.mubr.bf16.vlgmr.msra.gmra.mxu0 %v1628_v43  ;;  %v5158_v43 = vcombine.high %v2337_v36, %v2341_v37 }
 0x176   :  { %2740 = vmatpush1.bf16.msra.mxu0 %v5189_v2  ;;  %2771 = vmatprep.mubr.bf16.mxu0 %v6037_v26 }
 0x177   :  { %2741 = vmatprep.subr.bf16.mxu0 %v5182_v8  ;;  %v2318_v8 = vld [vmem:[%s8011_s5 + $0x28] sm:$0xff] }
 0x17a   :  { %2742 = vmatpush1.bf16.msra.mxu0 %v5181_v21  ;;  %v2376_v21 = vld [vmem:[%s8011_s5 + $0x1f8] sm:$0xff] }
 0x17b   :  { %2743 = vmatprep.subr.bf16.mxu0 %v5174_v24  ;;  %v5195_v24 = vcombine.low %v2372_v19, %v2376_v21 }
 0x17e   :  { %2744 = vmatpush1.bf16.msra.mxu0 %v5173_v32 }
 0x17f   :  { %2745 = vmatprep.subr.bf16.mxu0 %v5166_v34 }
 0x182   :  { %2746 = vmatpush1.bf16.msra.mxu0 %v5165_v41 }
 0x183   :  { %2747 = vmatprep.subr.bf16.mxu0 %v5158_v43 }
 0x18d   :  { %v1609_v49 = vpop.f32.mrf.mxu0 }
 0x18f   :  { %v1568_v23 = vpop.f32.mrf.mxu1  ;;  %v1611_v17 = vpop.f32.mrf.mxu0 }
 0x190   :  { %v1569_v51 = vadd.f32 %v1568_v23, %v271_v48  ;;  %v5160_v48 = vcombine.high %v2338_v39, %v2342_v40  ;;  %v2330_v23 = vld [vmem:[%s8011_s5 + $0x88] sm:$0xff] }
 0x191   :  { %v1570_v52 = vpop.f32.mrf.mxu1  ;;  %v1613_v55 = vpop.f32.mrf.mxu0 }
 0x192   :  { %v1610_v53 = vadd.f32 %v1609_v49, %v1569_v51  ;;  %v1571_v54 = vadd.f32 %v1570_v52, %v275_v50  ;;  %v2329_v49 = vld [vmem:[%s8011_s5 + $0x80] sm:$0xff]  ;;  %v2334_v51 = vld [vmem:[%s8011_s5 + $0xa8] sm:$0xff]  ;;  %v5159_v52 = vcombine.low %v2338_v39, %v2342_v40 }
 0x193   :  { %v1572_v56 = vpop.f32.mrf.mxu1  ;;  %v1614_v57 = vpop.f32.mrf.mxu0  ;;  %v2333_v50 = vld [vmem:[%s8011_s5 + $0xa0] sm:$0xff] }
 0x194   :  { %v1612_v38 = vadd.f32 %v1611_v17, %v1571_v54  ;;  %v1622_v58 = vmax.f32 %v1610_v53, 0.0  ;;  %v5157_v17 = vcombine.low %v2337_v36, %v2341_v37  ;;  %v5150_v53 = vcombine.high %v2329_v49, %v2333_v50 }
 0x195   :  { %v1573_v59 = vpop.f32.mrf.mxu1  ;;  %v5152_v54 = vcombine.high %v2330_v23, %v2334_v51  ;;  %v5149_v55 = vcombine.low %v2329_v49, %v2333_v50  ;;  %v5151_v56 = vcombine.low %v2330_v23, %v2334_v51 }
 0x196   :  { %v1623_v60 = vmax.f32 %v1612_v38, 0.0  ;;  %v1630_v63 = vpack.c.bf16 %v1622_v58, %v1622_v58  ;;  %2748 = vmatpush1.bf16.msra.mxu0 %v5157_v17  ;;  %v2363_v17 = vld [vmem:[%s8011_s5 + $0x190] sm:$0xff] }
 0x197   :  { %2749 = vmatprep.subr.bf16.mxu0 %v5150_v53  ;;  %v2367_v53 = vld [vmem:[%s8011_s5 + $0x1b0] sm:$0xff] }
 0x198   :  { %v1631_v62 = vpack.c.bf16 %v1623_v60, %v1623_v60  ;;  %v5185_v15 = vcombine.low %v2363_v17, %v2367_v53 }
 0x19a   :  { %2303 = vmatprep.mubr.bf16.mxu1 %v1631_v62  ;;  %2750 = vmatpush1.bf16.msra.mxu0 %v5149_v55  ;;  %v2321_v62 = vld [vmem:[%s8011_s5 + $0x40] sm:$0xff]  ;;  %v2368_v55 = vld [vmem:[%s8011_s5 + $0x1b8] sm:$0xff] }
 0x19b   :  { %2304 = vmatmul.mubr.bf16.vlgmr.msra.gmra.mxu1 %v1630_v63  ;;  %v2325_v63 = vld [vmem:[%s8011_s5 + $0x60] sm:$0xff] }
 0x19c   :  { %2781 = vmatpush1.bf16.msra.mxu1 %v5191_v6  ;;  %v5142_v0 = vcombine.high %v2321_v62, %v2325_v63  ;;  %v5141_v2 = vcombine.low %v2321_v62, %v2325_v63  ;;  %v2314_v6 = vld [vmem:[%s8011_s5 + $0x8] sm:$0xff]  ;;  %2812 = vmatprep.mubr.bf16.mxu1 %v6037_v26  ;;  %v2356_v62 = vld [vmem:[%s8011_s5 + $0x158] sm:$0xff] }
 0x19d   :  { %2782 = vmatprep.subr.bf16.mxu1 %v5184_v12  ;;  %v5135_v10 = vcombine.low %v2314_v6, %v2318_v8  ;;  %v5136_v11 = vcombine.high %v2314_v6, %v2318_v8  ;;  %v2371_v12 = vld [vmem:[%s8011_s5 + $0x1d0] sm:$0xff]  ;;  %v2360_v63 = vld [vmem:[%s8011_s5 + $0x178] sm:$0xff] }
 0x19e   :  { %2751 = vmatprep.subr.bf16.mxu0 %v5142_v0  ;;  %v5194_v20 = vcombine.high %v2371_v12, %v2375_v18 }
 0x19f   :  { %2752 = vmatpush1.bf16.msra.mxu0 %v5141_v2  ;;  %v5180_v2 = vcombine.high %v2356_v62, %v2360_v63 }
 0x1a0   :  { %2783 = vmatpush1.bf16.msra.mxu1 %v5183_v22  ;;  %2753 = vmatprep.subr.bf16.mxu0 %v5134_v7  ;;  %v5193_v22 = vcombine.low %v2371_v12, %v2375_v18  ;;  %v5179_v7 = vcombine.low %v2356_v62, %v2360_v63  ;;  %v2340_v12 = vld [vmem:[%s8011_s5 + $0xd8] sm:$0xff]  ;;  %v5621_v62 = vld [vmem:[%s8013_s7 + $0xc0] ss:$16 sps:$4 sm:$0xff]  }
 0x1a1   :  { %2784 = vmatprep.subr.bf16.mxu1 %v5176_v25  ;;  %v5196_v25 = vcombine.high %v2372_v19, %v2376_v21  ;;  %v2344_v18 = vld [vmem:[%s8011_s5 + $0xf8] sm:$0xff]  ;;  %v5624_v63 = vld [vmem:[%s8013_s7 + $0x2c0] ss:$16 sps:$4 sm:$0xff]  }
 0x1a3   :  { %2754 = vmatpush1.bf16.msra.mxu0 %v5133_v9  ;;  %v5172_v9 = vcombine.high %v2348_v4, %v2352_v5 }
 0x1a4   :  { %2785 = vmatpush1.bf16.msra.mxu1 %v5175_v33  ;;  %2821 = vmatprep.subr.bf16.mxu0 %v5194_v20  ;;  %v5171_v20 = vcombine.low %v2348_v4, %v2352_v5  ;;  %v5636_v4 = vld [vmem:[%s8013_s7 + $0x280] ss:$16 sps:$4 sm:$0xff]   ;;  %v5641_v5 = vld [vmem:[%s8013_s7 + $0x64] ss:$16 sps:$4 sm:$0xff]  }
 0x1a5   :  { %2786 = vmatprep.subr.bf16.mxu1 %v5168_v35 }
 0x1a8   :  { %2787 = vmatpush1.bf16.msra.mxu1 %v5167_v42 }
 0x1a9   :  { %2788 = vmatprep.subr.bf16.mxu1 %v5160_v48 }
 0x1ac   :  { %2789 = vmatpush1.bf16.msra.mxu1 %v5159_v52 }
 0x1ad   :  { %2790 = vmatprep.subr.bf16.mxu1 %v5152_v54  ;;  %v2364_v54 = vld [vmem:[%s8011_s5 + $0x198] sm:$0xff] }
 0x1ae   :  { %v5187_v0 = vcombine.low %v2364_v54, %v2368_v55 }
 0x1b0   :  { %2791 = vmatpush1.bf16.msra.mxu1 %v5151_v56 }
 0x1b1   :  { %2792 = vmatprep.subr.bf16.mxu1 %v5144_v3  ;;  %v2351_v3 = vld [vmem:[%s8011_s5 + $0x130] sm:$0xff] }
 0x1b4   :  { %2793 = vmatpush1.bf16.msra.mxu1 %v5143_v61  ;;  %v2347_v61 = vld [vmem:[%s8011_s5 + $0x110] sm:$0xff] }
 0x1b5   :  { %2794 = vmatprep.subr.bf16.mxu1 %v5136_v11  ;;  %v5170_v8 = vcombine.high %v2347_v61, %v2351_v3  ;;  %v2343_v11 = vld [vmem:[%s8011_s5 + $0xf0] sm:$0xff]  ;;  %v5169_v19 = vcombine.low %v2347_v61, %v2351_v3 }
 0x1b6   :  { %v5638_v61 = vld [vmem:[%s8013_s7 + $0x284] ss:$16 sps:$4 sm:$0xff]   ;;  %v5633_v3 = vld [vmem:[%s8013_s7 + $0x80] ss:$16 sps:$4 sm:$0xff]  }
 0x1b8   :  { %2795 = vmatpush1.bf16.msra.mxu1 %v5135_v10  ;;  %v2339_v10 = vld [vmem:[%s8011_s5 + $0xd0] sm:$0xff] }
 0x1b9   :  { %2862 = vmatprep.subr.bf16.mxu1 %v5196_v25  ;;  %v5162_v21 = vcombine.high %v2339_v10, %v2343_v11  ;;  %v2335_v25 = vld [vmem:[%s8011_s5 + $0xb0] sm:$0xff] }
 0x1d1   :  { %v5477_v38 = vpop.f32.mrf.mxu0 }
 0x1d3   :  { %v5478_v57 = vpop.f32.mrf.mxu0 }
 0x1d4   :  { %v5479_v58 = vadd.f32 %v5478_v57, %v5477_v38  ;;  %v5186_v57 = vcombine.high %v2363_v17, %v2367_v53 }
 0x1d5   :  { %v5480_v59 = vpop.f32.mrf.mxu0 }
 0x1d6   :  { %v2186_v32 = vadd.f32 %v5479_v58, %v5068_v29  ;;  %v5188_v58 = vcombine.high %v2364_v54, %v2368_v55  ;;  %v2355_v59 = vld [vmem:[%s8011_s5 + $0x150] sm:$0xff]  ;;  %v2336_v29 = vld [vmem:[%s8011_s5 + $0xb8] sm:$0xff] }
 0x1d7   :  { %v5481_v60 = vpop.f32.mrf.mxu0  ;;  %v5617_v55 = vld [vmem:[%s8013_s7 + $0xe4] ss:$16 sps:$4 sm:$0xff]  }
 0x1d8   :  { %v2359_v60 = vld [vmem:[%s8011_s5 + $0x170] sm:$0xff] }
 0x1d9   :  { %v5178_v1 = vcombine.high %v2355_v59, %v2359_v60  ;;  %v5177_v6 = vcombine.low %v2355_v59, %v2359_v60  ;;  %v5623_v59 = vld [vmem:[%s8013_s7 + $0xc4] ss:$16 sps:$4 sm:$0xff]  }
 0x1da   :  { %v5626_v60 = vld [vmem:[%s8013_s7 + $0x2c4] ss:$16 sps:$4 sm:$0xff]  }
 0x1f7   :  { %v5499_v30 = vpop.f32.mrf.mxu1 }
 0x1f9   :  { %v5500_v31 = vpop.f32.mrf.mxu1 }
 0x1fa   :  { %v5501_v33 = vadd.f32 %v5500_v31, %v5499_v30  ;;  %v5161_v30 = vcombine.low %v2339_v10, %v2343_v11  ;;  %v5163_v31 = vcombine.low %v2340_v12, %v2344_v18  ;;  %v5650_v10 = vld [vmem:[%s8013_s7 + $0x244] ss:$16 sps:$4 sm:$0xff]   ;;  %v5645_v11 = vld [vmem:[%s8013_s7 + $0x40] ss:$16 sps:$4 sm:$0xff]  }
 0x1fb   :  { %v5502_v34 = vpop.f32.mrf.mxu1 }
 0x1fc   :  { %v2226_v35 = vadd.f32 %v5501_v33, %v2186_v32  ;;  %v2323_v34 = vld [vmem:[%s8011_s5 + $0x50] sm:$0xff] }
 0x1fd   :  { %v5503_v36 = vpop.f32.mrf.mxu1 }
 0x1fe   :  { %v2324_v36 = vld [vmem:[%s8011_s5 + $0x58] sm:$0xff] }
 0x235   :  { %v5521_v37 = vpop.f32.mrf.mxu0 }
 0x237   :  { %v5522_v39 = vpop.f32.mrf.mxu0 }
 0x238   :  { %v5523_v42 = vadd.f32 %v5522_v39, %v5521_v37  ;;  %v2328_v37 = vld [vmem:[%s8011_s5 + $0x78] sm:$0xff] }
 0x239   :  { %v5524_v40 = vpop.f32.mrf.mxu0 }
 0x23a   :  { %v2266_v49 = vadd.f32 %v5523_v42, %v2226_v35  ;;  %v2327_v35 = vld [vmem:[%s8011_s5 + $0x70] sm:$0xff]  ;;  %v5148_v42 = vcombine.high %v2324_v36, %v2328_v37 }
 0x23b   :  { %v5525_v41 = vpop.f32.mrf.mxu0 }
 0x23c   :  { %v5146_v41 = vcombine.high %v2323_v34, %v2327_v35 }
 0x25b   :  { %v5543_v43 = vpop.f32.mrf.mxu1 }
 0x25d   :  { %v5544_v48 = vpop.f32.mrf.mxu1 }
 0x25e   :  { %v5545_v50 = vadd.f32 %v5544_v48, %v5543_v43  ;;  %v2315_v43 = vld [vmem:[%s8011_s5 + $0x10] sm:$0xff] }
 0x25f   :  { %v5546_v23 = vpop.f32.mrf.mxu1  ;;  %v2319_v48 = vld [vmem:[%s8011_s5 + $0x30] sm:$0xff] }
 0x260   :  { %v2306_v51 = vadd.f32 %v5545_v50, %v2266_v49  ;;  %v2316_v49 = vld [vmem:[%s8011_s5 + $0x18] sm:$0xff]  ;;  %v5145_v23 = vcombine.low %v2323_v34, %v2327_v35  ;;  %v5138_v17 = vcombine.high %v2315_v43, %v2319_v48  ;;  %v5137_v53 = vcombine.low %v2315_v43, %v2319_v48  ;;  %v5674_v34 = vld [vmem:[%s8013_s7 + $0x3c4] ss:$16 sps:$4 sm:$0xff]   ;;  %v5669_v35 = vld [vmem:[%s8013_s7 + $0x1c0] ss:$16 sps:$4 sm:$0xff]  }
 0x261   :  { %v5547_v52 = vpop.f32.mrf.mxu1  ;;  %v2320_v50 = vld [vmem:[%s8011_s5 + $0x38] sm:$0xff]  ;;  %v5686_v43 = vld [vmem:[%s8013_s7 + $0x384] ss:$16 sps:$4 sm:$0xff]   ;;  %v5681_v48 = vld [vmem:[%s8013_s7 + $0x180] ss:$16 sps:$4 sm:$0xff]  }
 0x262   :  { %v2311_v56 = vmax.f32 %v2306_v51, 0.0  ;;  %v5147_v51 = vcombine.low %v2324_v36, %v2328_v37  ;;  %v5140_v52 = vcombine.high %v2316_v49, %v2320_v50  ;;  %v5139_v54 = vcombine.low %v2316_v49, %v2320_v50  ;;  %v5672_v36 = vld [vmem:[%s8013_s7 + $0x3c0] ss:$16 sps:$4 sm:$0xff]   ;;  %v5677_v37 = vld [vmem:[%s8013_s7 + $0x1a4] ss:$16 sps:$4 sm:$0xff]  }
 0x263   :  { %v5684_v49 = vld [vmem:[%s8013_s7 + $0x380] ss:$16 sps:$4 sm:$0xff]   ;;  %v5689_v50 = vld [vmem:[%s8013_s7 + $0x164] ss:$16 sps:$4 sm:$0xff]  }
 0x264   :  { %v7087_v38 = vpack.c.bf16 %v2311_v56, %v2311_v56  ;;  %v5620_v56 = vld [vmem:[%s8013_s7 + $0x2e4] ss:$16 sps:$4 sm:$0xff]  }
 0x266   :  { %2772 = vmatmul.mubr.bf16.vlgmr.msra.gmra.mxu0 %v7087_v38  ;;  %2813 = vmatmul.mubr.bf16.vlgmr.msra.gmra.mxu1 %v7087_v38 }
 0x267   :  { %2822 = vmatpush1.bf16.msra.mxu0 %v5193_v22  ;;  %2863 = vmatpush1.bf16.msra.mxu1 %v5195_v24  ;;  %v5164_v22 = vcombine.high %v2340_v12, %v2344_v18  ;;  %v2331_v24 = vld [vmem:[%s8011_s5 + $0x90] sm:$0xff] }
 0x268   :  { %2823 = vmatprep.subr.bf16.mxu0 %v5186_v57  ;;  %2864 = vmatprep.subr.bf16.mxu1 %v5188_v58  ;;  %v5154_v32 = vcombine.high %v2331_v24, %v2335_v25  ;;  %v5153_v39 = vcombine.low %v2331_v24, %v2335_v25  ;;  %v5615_v57 = vld [vmem:[%s8013_s7 + $0xe0] ss:$16 sps:$4 sm:$0xff]   ;;  %v5653_v18 = vld [vmem:[%s8013_s7 + $0x24] ss:$16 sps:$4 sm:$0xff]  }
 0x269   :  { %2853 = vmatprep.mubr.bf16.mxu0 %v6037_v26  ;;  %2894 = vmatprep.mubr.bf16.mxu1 %v6037_v26  ;;  %v2332_v26 = vld [vmem:[%s8011_s5 + $0x98] sm:$0xff]  ;;  %v5618_v58 = vld [vmem:[%s8013_s7 + $0x2e0] ss:$16 sps:$4 sm:$0xff]   ;;  %v5662_v24 = vld [vmem:[%s8013_s7 + $0x204] ss:$16 sps:$4 sm:$0xff]  }
 0x26a   :  { %v5156_v33 = vcombine.high %v2332_v26, %v2336_v29  ;;  %v5155_v40 = vcombine.low %v2332_v26, %v2336_v29  ;;  %v5648_v12 = vld [vmem:[%s8013_s7 + $0x240] ss:$16 sps:$4 sm:$0xff]   ;;  %v5665_v29 = vld [vmem:[%s8013_s7 + $0x1e4] ss:$16 sps:$4 sm:$0xff]  }
 0x26b   :  { %2824 = vmatpush1.bf16.msra.mxu0 %v5185_v15  ;;  %2865 = vmatpush1.bf16.msra.mxu1 %v5187_v0  ;;  %v5629_v15 = vld [vmem:[%s8013_s7 + $0xa4] ss:$16 sps:$4 sm:$0xff]   ;;  %v5627_v0 = vld [vmem:[%s8013_s7 + $0xa0] ss:$16 sps:$4 sm:$0xff]  }
 0x26c   :  { %2825 = vmatprep.subr.bf16.mxu0 %v5178_v1  ;;  %2866 = vmatprep.subr.bf16.mxu1 %v5180_v2  ;;  %v5630_v1 = vld [vmem:[%s8013_s7 + $0x2a0] ss:$16 sps:$4 sm:$0xff]   ;;  %v5635_v2 = vld [vmem:[%s8013_s7 + $0x84] ss:$16 sps:$4 sm:$0xff]  }
 0x26d   :  { %v5657_v25 = vld [vmem:[%s8013_s7] ss:$16 sps:$4 sm:$0xff]  }
 0x26e   :  { %v5660_v26 = vld [vmem:[%s8013_s7 + $0x200] ss:$16 sps:$4 sm:$0xff]  }
 0x26f   :  { %2826 = vmatpush1.bf16.msra.mxu0 %v5177_v6  ;;  %2867 = vmatpush1.bf16.msra.mxu1 %v5179_v7  ;;  %v5644_v6 = vld [vmem:[%s8013_s7 + $0x264] ss:$16 sps:$4 sm:$0xff]   ;;  %v5639_v7 = vld [vmem:[%s8013_s7 + $0x60] ss:$16 sps:$4 sm:$0xff]  }
 0x270   :  { %2827 = vmatprep.subr.bf16.mxu0 %v5170_v8  ;;  %2868 = vmatprep.subr.bf16.mxu1 %v5172_v9  ;;  %v5642_v8 = vld [vmem:[%s8013_s7 + $0x260] ss:$16 sps:$4 sm:$0xff]   ;;  %v5647_v9 = vld [vmem:[%s8013_s7 + $0x44] ss:$16 sps:$4 sm:$0xff]  }
 0x273   :  { %2828 = vmatpush1.bf16.msra.mxu0 %v5169_v19  ;;  %2869 = vmatpush1.bf16.msra.mxu1 %v5171_v20  ;;  %v5656_v19 = vld [vmem:[%s8013_s7 + $0x224] ss:$16 sps:$4 sm:$0xff]   ;;  %v5651_v20 = vld [vmem:[%s8013_s7 + $0x20] ss:$16 sps:$4 sm:$0xff]  }
 0x274   :  { %2829 = vmatprep.subr.bf16.mxu0 %v5162_v21  ;;  %2870 = vmatprep.subr.bf16.mxu1 %v5164_v22  ;;  %v5654_v21 = vld [vmem:[%s8013_s7 + $0x220] ss:$16 sps:$4 sm:$0xff]   ;;  %v5659_v22 = vld [vmem:[%s8013_s7 + $0x4] ss:$16 sps:$4 sm:$0xff]  }
 0x277   :  { %2830 = vmatpush1.bf16.msra.mxu0 %v5161_v30  ;;  %2871 = vmatpush1.bf16.msra.mxu1 %v5163_v31  ;;  %v5668_v30 = vld [vmem:[%s8013_s7 + $0x3e4] ss:$16 sps:$4 sm:$0xff]   ;;  %v5663_v31 = vld [vmem:[%s8013_s7 + $0x1e0] ss:$16 sps:$4 sm:$0xff]  }
 0x278   :  { %2831 = vmatprep.subr.bf16.mxu0 %v5154_v32  ;;  %2872 = vmatprep.subr.bf16.mxu1 %v5156_v33  ;;  %v5666_v32 = vld [vmem:[%s8013_s7 + $0x3e0] ss:$16 sps:$4 sm:$0xff]   ;;  %v5671_v33 = vld [vmem:[%s8013_s7 + $0x1c4] ss:$16 sps:$4 sm:$0xff]  }
 0x27b   :  { %2832 = vmatpush1.bf16.msra.mxu0 %v5153_v39  ;;  %2873 = vmatpush1.bf16.msra.mxu1 %v5155_v40  ;;  %v5680_v39 = vld [vmem:[%s8013_s7 + $0x3a4] ss:$16 sps:$4 sm:$0xff]   ;;  %v5675_v40 = vld [vmem:[%s8013_s7 + $0x1a0] ss:$16 sps:$4 sm:$0xff]  }
 0x27c   :  { %2833 = vmatprep.subr.bf16.mxu0 %v5146_v41  ;;  %2874 = vmatprep.subr.bf16.mxu1 %v5148_v42  ;;  %v5678_v41 = vld [vmem:[%s8013_s7 + $0x3a0] ss:$16 sps:$4 sm:$0xff]   ;;  %v5683_v42 = vld [vmem:[%s8013_s7 + $0x184] ss:$16 sps:$4 sm:$0xff]  }
 0x27f   :  { %2834 = vmatpush1.bf16.msra.mxu0 %v5145_v23  ;;  %2875 = vmatpush1.bf16.msra.mxu1 %v5147_v51  ;;  %v5692_v23 = vld [vmem:[%s8013_s7 + $0x364] ss:$16 sps:$4 sm:$0xff]   ;;  %v5687_v51 = vld [vmem:[%s8013_s7 + $0x160] ss:$16 sps:$4 sm:$0xff]  }
 0x280   :  { %2835 = vmatprep.subr.bf16.mxu0 %v5138_v17  ;;  %2876 = vmatprep.subr.bf16.mxu1 %v5140_v52  ;;  %v5690_v17 = vld [vmem:[%s8013_s7 + $0x360] ss:$16 sps:$4 sm:$0xff]   ;;  %v5695_v52 = vld [vmem:[%s8013_s7 + $0x144] ss:$16 sps:$4 sm:$0xff]  }
 0x283   :  { %2836 = vmatpush1.bf16.msra.mxu0 %v5137_v53  ;;  %2877 = vmatpush1.bf16.msra.mxu1 %v5139_v54  ;;  %v5698_v53 = vld [vmem:[%s8013_s7 + $0x344] ss:$16 sps:$4 sm:$0xff]   ;;  %v5693_v54 = vld [vmem:[%s8013_s7 + $0x140] ss:$16 sps:$4 sm:$0xff]  }
 0x284   :  { %4477 = vmatprep.subr.bf16.mxu0 %v5617_v55  ;;  %4518 = vmatprep.subr.bf16.mxu1 %v5620_v56  ;;  %v5696_v55 = vld [vmem:[%s8013_s7 + $0x340] ss:$16 sps:$4 sm:$0xff]   ;;  %v5701_v56 = vld [vmem:[%s8013_s7 + $0x124] ss:$16 sps:$4 sm:$0xff]  }
 0x286   :  { %2854 = vmatmul.mubr.bf16.vlgmr.msra.gmra.mxu0 %v7087_v38  ;;  %2895 = vmatmul.mubr.bf16.vlgmr.msra.gmra.mxu1 %v7087_v38  ;;  %v5632_v38 = vld [vmem:[%s8013_s7 + $0x2a4] ss:$16 sps:$4 sm:$0xff]  }
 0x287   :  { %4478 = vmatpush1.bf16.msra.mxu0 %v5615_v57  ;;  %4519 = vmatpush1.bf16.msra.mxu1 %v5618_v58  ;;  %v5704_v57 = vld [vmem:[%s8013_s7 + $0x324] ss:$16 sps:$4 sm:$0xff]   ;;  %v5699_v58 = vld [vmem:[%s8013_s7 + $0x120] ss:$16 sps:$4 sm:$0xff]  }
 0x288   :  { %4479 = vmatprep.subr.bf16.mxu0 %v5623_v59  ;;  %4520 = vmatprep.subr.bf16.mxu1 %v5626_v60  ;;  %v5702_v59 = vld [vmem:[%s8013_s7 + $0x320] ss:$16 sps:$4 sm:$0xff]   ;;  %v5707_v60 = vld [vmem:[%s8013_s7 + $0x104] ss:$16 sps:$4 sm:$0xff]  }
 0x28b   :  { %4480 = vmatpush1.bf16.msra.mxu0 %v5621_v62  ;;  %4521 = vmatpush1.bf16.msra.mxu1 %v5624_v63  ;;  %v5710_v62 = vld [vmem:[%s8013_s7 + $0x304] ss:$16 sps:$4 sm:$0xff]   ;;  %v5705_v63 = vld [vmem:[%s8013_s7 + $0x100] ss:$16 sps:$4 sm:$0xff]  }
 0x28c   :  { %4481 = vmatprep.subr.bf16.mxu0 %v5629_v15  ;;  %4522 = vmatprep.subr.bf16.mxu1 %v5632_v38  ;;  %v5708_v15 = vld [vmem:[%s8013_s7 + $0x300] ss:$16 sps:$4 sm:$0xff]   ;;  %v5713_v38 = vld [vmem:[%s8013_s7 + $0x4e4] ss:$16 sps:$4 sm:$0xff]  }
 0x28f   :  { %4482 = vmatpush1.bf16.msra.mxu0 %v5627_v0  ;;  %4523 = vmatpush1.bf16.msra.mxu1 %v5630_v1  ;;  %v5716_v0 = vld [vmem:[%s8013_s7 + $0x6e4] ss:$16 sps:$4 sm:$0xff]  }
 0x290   :  { %4483 = vmatprep.subr.bf16.mxu0 %v5635_v2  ;;  %4524 = vmatprep.subr.bf16.mxu1 %v5638_v61  ;;  %v7366_v1 = vld [vmem:[%s8012_s6] sm:$0xff] }
 0x291   :  { %v2382_v2 = vrot.slane %v7366_v1, %v6834_v14  ;;  %v2390_v61 = vrot.slane %v7366_v1, %v6882_v45 }
 0x293   :  { %4484 = vmatpush1.bf16.msra.mxu0 %v5633_v3  ;;  %4525 = vmatpush1.bf16.msra.mxu1 %v5636_v4  ;;  %v2386_v3 = vrot.slane %v7366_v1, %v6842_v16  ;;  %v2394_v4 = vrot.slane %v7366_v1, %v6888_v47 }
 0x294   :  { %4485 = vmatprep.subr.bf16.mxu0 %v5641_v5  ;;  %4526 = vmatprep.subr.bf16.mxu1 %v5644_v6 }
 0x297   :  { %4486 = vmatpush1.bf16.msra.mxu0 %v5639_v7  ;;  %4527 = vmatpush1.bf16.msra.mxu1 %v5642_v8 }
 0x298   :  { %4487 = vmatprep.subr.bf16.mxu0 %v5647_v9  ;;  %4528 = vmatprep.subr.bf16.mxu1 %v5650_v10 }
 0x29b   :  { %4488 = vmatpush1.bf16.msra.mxu0 %v5645_v11  ;;  %4529 = vmatpush1.bf16.msra.mxu1 %v5648_v12 }
 0x29c   :  { %4489 = vmatprep.subr.bf16.mxu0 %v5653_v18  ;;  %4530 = vmatprep.subr.bf16.mxu1 %v5656_v19 }
 0x29f   :  { %4490 = vmatpush1.bf16.msra.mxu0 %v5651_v20  ;;  %4531 = vmatpush1.bf16.msra.mxu1 %v5654_v21 }
 0x2a0   :  { %4491 = vmatprep.subr.bf16.mxu0 %v5659_v22  ;;  %4532 = vmatprep.subr.bf16.mxu1 %v5662_v24 }
 0x2a3   :  { %4492 = vmatpush1.bf16.msra.mxu0 %v5657_v25  ;;  %4533 = vmatpush1.bf16.msra.mxu1 %v5660_v26 }
 0x2a4   :  { %4493 = vmatprep.subr.bf16.mxu0 %v5665_v29  ;;  %4534 = vmatprep.subr.bf16.mxu1 %v5668_v30 }
 0x2a7   :  { %4494 = vmatpush2.bf16.msra.mxu0 %v5663_v31  ;;  %4535 = vmatpush2.bf16.msra.mxu1 %v5666_v32  ;;  %v5711_v31 = vld [vmem:[%s8013_s7 + $0x4e0] ss:$16 sps:$4 sm:$0xff]  }
 0x2a8   :  { %4495 = vmatprep.subr.bf16.mxu0 %v5671_v33  ;;  %4536 = vmatprep.subr.bf16.mxu1 %v5674_v34  ;;  %v5714_v32 = vld [vmem:[%s8013_s7 + $0x6e0] ss:$16 sps:$4 sm:$0xff]  }
 0x2ab   :  { %4496 = vmatpush2.bf16.msra.mxu0 %v5669_v35  ;;  %4537 = vmatpush2.bf16.msra.mxu1 %v5672_v36  ;;  %v5719_v35 = vld [vmem:[%s8013_s7 + $0x4c4] ss:$16 sps:$4 sm:$0xff]  }
 0x2ac   :  { %4497 = vmatprep.subr.bf16.mxu0 %v5677_v37  ;;  %4538 = vmatprep.subr.bf16.mxu1 %v5680_v39  ;;  %v5722_v36 = vld [vmem:[%s8013_s7 + $0x6c4] ss:$16 sps:$4 sm:$0xff]   ;;  %v5717_v37 = vld [vmem:[%s8013_s7 + $0x4c0] ss:$16 sps:$4 sm:$0xff]  }
 0x2ad   :  { %v5720_v39 = vld [vmem:[%s8013_s7 + $0x6c0] ss:$16 sps:$4 sm:$0xff]  }
 0x2af   :  { %4498 = vmatpush2.bf16.msra.mxu0 %v5675_v40  ;;  %4539 = vmatpush2.bf16.msra.mxu1 %v5678_v41  ;;  %v5725_v40 = vld [vmem:[%s8013_s7 + $0x4a4] ss:$16 sps:$4 sm:$0xff]  }
 0x2b0   :  { %4499 = vmatprep.subr.bf16.mxu0 %v5683_v42  ;;  %4540 = vmatprep.subr.bf16.mxu1 %v5686_v43  ;;  %v5728_v41 = vld [vmem:[%s8013_s7 + $0x6a4] ss:$16 sps:$4 sm:$0xff]   ;;  %v5723_v42 = vld [vmem:[%s8013_s7 + $0x4a0] ss:$16 sps:$4 sm:$0xff]  }
 0x2b1   :  { %v5726_v43 = vld [vmem:[%s8013_s7 + $0x6a0] ss:$16 sps:$4 sm:$0xff]  }
 0x2b3   :  { %4500 = vmatpush2.bf16.msra.mxu0 %v5681_v48  ;;  %4541 = vmatpush2.bf16.msra.mxu1 %v5684_v49  ;;  %v5731_v48 = vld [vmem:[%s8013_s7 + $0x484] ss:$16 sps:$4 sm:$0xff]  }
 0x2b4   :  { %4501 = vmatprep.subr.bf16.mxu0 %v5689_v50  ;;  %4542 = vmatprep.subr.bf16.mxu1 %v5692_v23  ;;  %v5734_v49 = vld [vmem:[%s8013_s7 + $0x684] ss:$16 sps:$4 sm:$0xff]   ;;  %v5729_v50 = vld [vmem:[%s8013_s7 + $0x480] ss:$16 sps:$4 sm:$0xff]  }
 0x2b5   :  { %v5732_v23 = vld [vmem:[%s8013_s7 + $0x680] ss:$16 sps:$4 sm:$0xff]  }
 0x2b7   :  { %4502 = vmatpush2.bf16.msra.mxu0 %v5687_v51  ;;  %4543 = vmatpush2.bf16.msra.mxu1 %v5690_v17  ;;  %v5737_v51 = vld [vmem:[%s8013_s7 + $0x464] ss:$16 sps:$4 sm:$0xff]  }
 0x2b8   :  { %4503 = vmatprep.subr.bf16.mxu0 %v5695_v52  ;;  %4544 = vmatprep.subr.bf16.mxu1 %v5698_v53  ;;  %v5740_v17 = vld [vmem:[%s8013_s7 + $0x664] ss:$16 sps:$4 sm:$0xff]   ;;  %v5735_v52 = vld [vmem:[%s8013_s7 + $0x460] ss:$16 sps:$4 sm:$0xff]  }
 0x2b9   :  { %v5738_v53 = vld [vmem:[%s8013_s7 + $0x660] ss:$16 sps:$4 sm:$0xff]  }
 0x2bb   :  { %4504 = vmatpush2.bf16.msra.mxu0 %v5693_v54  ;;  %4545 = vmatpush2.bf16.msra.mxu1 %v5696_v55  ;;  %v5743_v54 = vld [vmem:[%s8013_s7 + $0x444] ss:$16 sps:$4 sm:$0xff]  }
 0x2bc   :  { %4505 = vmatprep.subr.bf16.mxu0 %v5701_v56  ;;  %4546 = vmatprep.subr.bf16.mxu1 %v5704_v57  ;;  %v5746_v55 = vld [vmem:[%s8013_s7 + $0x644] ss:$16 sps:$4 sm:$0xff]   ;;  %v5741_v56 = vld [vmem:[%s8013_s7 + $0x440] ss:$16 sps:$4 sm:$0xff]  }
 0x2bd   :  { %v5744_v57 = vld [vmem:[%s8013_s7 + $0x640] ss:$16 sps:$4 sm:$0xff]  }
 0x2bf   :  { %4506 = vmatpush2.bf16.msra.mxu0 %v5699_v58  ;;  %4547 = vmatpush2.bf16.msra.mxu1 %v5702_v59  ;;  %v5749_v58 = vld [vmem:[%s8013_s7 + $0x424] ss:$16 sps:$4 sm:$0xff]  }
 0x2c0   :  { %4507 = vmatprep.subr.bf16.mxu0 %v5707_v60  ;;  %4548 = vmatprep.subr.bf16.mxu1 %v5710_v62  ;;  %v5752_v59 = vld [vmem:[%s8013_s7 + $0x624] ss:$16 sps:$4 sm:$0xff]   ;;  %v2402_v60 = vrot.slane %v7366_v1, %v266_v28  ;;  %v2410_v62 = vrot.slane %v7366_v1, %v274_v46 }
 0x2c1   :  { %v5755_v28 = vld [vmem:[%s8013_s7 + $0x404] ss:$16 sps:$4 sm:$0xff]  }
 0x2c2   :  { %v5758_v46 = vld [vmem:[%s8013_s7 + $0x604] ss:$16 sps:$4 sm:$0xff]  }
 0x2c3   :  { %4508 = vmatpush2.bf16.msra.mxu0 %v5705_v63  ;;  %4549 = vmatpush2.bf16.msra.mxu1 %v5708_v15  ;;  %v5747_v63 = vld [vmem:[%s8013_s7 + $0x420] ss:$16 sps:$4 sm:$0xff]  }
 0x2c4   :  { %4559 = vmatprep.subr.bf16.mxu0 %v5713_v38  ;;  %4600 = vmatprep.subr.bf16.mxu1 %v5716_v0  ;;  %v5750_v15 = vld [vmem:[%s8013_s7 + $0x620] ss:$16 sps:$4 sm:$0xff]  }
 0x326   :  { %v2773_v5 = vpop.f32.mrf.mxu0  ;;  %v2814_v6 = vpop.f32.mrf.mxu1 }
 0x327   :  { %v2774_v7 = vadd.f32 %v2773_v5, %v2382_v2  ;;  %v2815_v8 = vadd.f32 %v2814_v6, %v2390_v61  ;;  %v5753_v5 = vld [vmem:[%s8013_s7 + $0x400] ss:$16 sps:$4 sm:$0xff]  }
 0x328   :  { %v2775_v9 = vpop.f32.mrf.mxu0  ;;  %v2816_v10 = vpop.f32.mrf.mxu1  ;;  %v5756_v6 = vld [vmem:[%s8013_s7 + $0x600] ss:$16 sps:$4 sm:$0xff]  }
 0x329   :  { %v2776_v11 = vadd.f32 %v2775_v9, %v2386_v3  ;;  %v2817_v12 = vadd.f32 %v2816_v10, %v2394_v4  ;;  %v2903_v18 = vmax.f32 %v2774_v7, 0.0  ;;  %v2905_v19 = vmax.f32 %v2815_v8, 0.0  ;;  %v5761_v9 = vld [vmem:[%s8013_s7 + $0x5e4] ss:$16 sps:$4 sm:$0xff]  }
 0x32a   :  { %v2777_v20 = vpop.f32.mrf.mxu0  ;;  %v2818_v21 = vpop.f32.mrf.mxu1  ;;  %v5764_v10 = vld [vmem:[%s8013_s7 + $0x7e4] ss:$16 sps:$4 sm:$0xff]  }
 0x32b   :  { %v2904_v22 = vmax.f32 %v2776_v11, 0.0  ;;  %v2906_v24 = vmax.f32 %v2817_v12, 0.0  ;;  %v7386_v33 = vpack.c.bf16 %v2903_v18, %v2903_v18  ;;  %v7388_v34 = vpack.c.bf16 %v2905_v19, %v2905_v19 }
 0x32c   :  { %v2778_v25 = vpop.f32.mrf.mxu0  ;;  %v2819_v26 = vpop.f32.mrf.mxu1 }
 0x32d   :  { %v7376_v29 = vpack.c.bf16 %v2904_v22, %v2904_v22  ;;  %v7378_v30 = vpack.c.bf16 %v2906_v24, %v2906_v24  ;;  %v5759_v22 = vld [vmem:[%s8013_s7 + $0x5e0] ss:$16 sps:$4 sm:$0xff]   ;;  %v5767_v25 = vld [vmem:[%s8013_s7 + $0x5c4] ss:$16 sps:$4 sm:$0xff]  }
 0x32e   :  { %v5762_v24 = vld [vmem:[%s8013_s7 + $0x7e0] ss:$16 sps:$4 sm:$0xff]   ;;  %v5770_v26 = vld [vmem:[%s8013_s7 + $0x7c4] ss:$16 sps:$4 sm:$0xff]  }
 0x32f   :  { %4509 = vmatprep.mubr.bf16.mxu0 %v7376_v29  ;;  %4550 = vmatprep.mubr.bf16.mxu1 %v7378_v30 }
 0x330   :  { %4510 = vmatmul.mubr.bf16.vlgmr.msra.gmra.mxu0 %v7386_v33  ;;  %4551 = vmatmul.mubr.bf16.vlgmr.msra.gmra.mxu1 %v7388_v34 }
 0x331   :  { %4560 = vmatpush1.bf16.msra.mxu0 %v5711_v31  ;;  %4601 = vmatpush1.bf16.msra.mxu1 %v5714_v32  ;;  %v5765_v31 = vld [vmem:[%s8013_s7 + $0x5c0] ss:$16 sps:$4 sm:$0xff]  }
 0x332   :  { %4561 = vmatprep.subr.bf16.mxu0 %v5719_v35  ;;  %4602 = vmatprep.subr.bf16.mxu1 %v5722_v36  ;;  %v5768_v32 = vld [vmem:[%s8013_s7 + $0x7c0] ss:$16 sps:$4 sm:$0xff]   ;;  %v5773_v35 = vld [vmem:[%s8013_s7 + $0x5a4] ss:$16 sps:$4 sm:$0xff]  }
 0x333   :  { %v5776_v36 = vld [vmem:[%s8013_s7 + $0x7a4] ss:$16 sps:$4 sm:$0xff]  }
 0x335   :  { %4562 = vmatpush1.bf16.msra.mxu0 %v5717_v37  ;;  %4603 = vmatpush1.bf16.msra.mxu1 %v5720_v39  ;;  %v5771_v37 = vld [vmem:[%s8013_s7 + $0x5a0] ss:$16 sps:$4 sm:$0xff]  }
 0x336   :  { %4563 = vmatprep.subr.bf16.mxu0 %v5725_v40  ;;  %4604 = vmatprep.subr.bf16.mxu1 %v5728_v41  ;;  %v5774_v39 = vld [vmem:[%s8013_s7 + $0x7a0] ss:$16 sps:$4 sm:$0xff]   ;;  %v5779_v40 = vld [vmem:[%s8013_s7 + $0x584] ss:$16 sps:$4 sm:$0xff]  }
 0x337   :  { %v5782_v41 = vld [vmem:[%s8013_s7 + $0x784] ss:$16 sps:$4 sm:$0xff]  }
 0x339   :  { %4564 = vmatpush1.bf16.msra.mxu0 %v5723_v42  ;;  %4605 = vmatpush1.bf16.msra.mxu1 %v5726_v43  ;;  %v5777_v42 = vld [vmem:[%s8013_s7 + $0x580] ss:$16 sps:$4 sm:$0xff]  }
 0x33a   :  { %4565 = vmatprep.subr.bf16.mxu0 %v5731_v48  ;;  %4606 = vmatprep.subr.bf16.mxu1 %v5734_v49  ;;  %v5780_v43 = vld [vmem:[%s8013_s7 + $0x780] ss:$16 sps:$4 sm:$0xff]   ;;  %v5785_v48 = vld [vmem:[%s8013_s7 + $0x564] ss:$16 sps:$4 sm:$0xff]  }
 0x33b   :  { %v5788_v49 = vld [vmem:[%s8013_s7 + $0x764] ss:$16 sps:$4 sm:$0xff]  }
 0x33d   :  { %4566 = vmatpush1.bf16.msra.mxu0 %v5729_v50  ;;  %4607 = vmatpush1.bf16.msra.mxu1 %v5732_v23  ;;  %v5783_v50 = vld [vmem:[%s8013_s7 + $0x560] ss:$16 sps:$4 sm:$0xff]  }
 0x33e   :  { %4567 = vmatprep.subr.bf16.mxu0 %v5737_v51  ;;  %4608 = vmatprep.subr.bf16.mxu1 %v5740_v17  ;;  %v5786_v23 = vld [vmem:[%s8013_s7 + $0x760] ss:$16 sps:$4 sm:$0xff]   ;;  %v5791_v51 = vld [vmem:[%s8013_s7 + $0x544] ss:$16 sps:$4 sm:$0xff]  }
 0x33f   :  { %v5794_v17 = vld [vmem:[%s8013_s7 + $0x744] ss:$16 sps:$4 sm:$0xff]  }
 0x341   :  { %4568 = vmatpush1.bf16.msra.mxu0 %v5735_v52  ;;  %4609 = vmatpush1.bf16.msra.mxu1 %v5738_v53  ;;  %v5789_v52 = vld [vmem:[%s8013_s7 + $0x540] ss:$16 sps:$4 sm:$0xff]  }
 0x342   :  { %4569 = vmatprep.subr.bf16.mxu0 %v5743_v54  ;;  %4610 = vmatprep.subr.bf16.mxu1 %v5746_v55  ;;  %v5792_v53 = vld [vmem:[%s8013_s7 + $0x740] ss:$16 sps:$4 sm:$0xff]   ;;  %v2398_v54 = vrot.slane %v7366_v1, %v262_v27  ;;  %v2406_v55 = vrot.slane %v7366_v1, %v270_v44 }
 0x343   :  { %v5795_v27 = vld [vmem:[%s8013_s7 + $0x520] ss:$16 sps:$4 sm:$0xff]  }
 0x345   :  { %4570 = vmatpush1.bf16.msra.mxu0 %v5741_v56  ;;  %4611 = vmatpush1.bf16.msra.mxu1 %v5744_v57  ;;  %v5797_v56 = vld [vmem:[%s8013_s7 + $0x524] ss:$16 sps:$4 sm:$0xff]  }
 0x346   :  { %v7472_v38 = vpop.f32.mrf.mxu0  ;;  %v7474_v0 = vpop.f32.mrf.mxu1  ;;  %4571 = vmatprep.subr.bf16.mxu0 %v5749_v58  ;;  %4612 = vmatprep.subr.bf16.mxu1 %v5752_v59  ;;  %v5800_v57 = vld [vmem:[%s8013_s7 + $0x724] ss:$16 sps:$4 sm:$0xff]  }
 0x347   :  { %v2856_v44 = vadd.f32 %v7472_v38, %v2398_v54  ;;  %v2897_v1 = vadd.f32 %v7474_v0, %v2406_v55  ;;  %v5803_v58 = vld [vmem:[%s8013_s7 + $0x504] ss:$16 sps:$4 sm:$0xff]   ;;  %v5809_v38 = vld [vmem:[%s8013_s7 + $0xec] ss:$16 sps:$4 sm:$0xff]  }
 0x348   :  { %v2857_v2 = vpop.f32.mrf.mxu0  ;;  %v2898_v61 = vpop.f32.mrf.mxu1  ;;  %v5806_v59 = vld [vmem:[%s8013_s7 + $0x704] ss:$16 sps:$4 sm:$0xff]   ;;  %v5812_v0 = vld [vmem:[%s8013_s7 + $0x2ec] ss:$16 sps:$4 sm:$0xff]  }
 0x349   :  { %v2858_v3 = vadd.f32 %v2857_v2, %v2402_v60  ;;  %v2899_v4 = vadd.f32 %v2898_v61, %v2410_v62  ;;  %4572 = vmatpush1.bf16.msra.mxu0 %v5747_v63  ;;  %4613 = vmatpush1.bf16.msra.mxu1 %v5750_v15  ;;  %v5801_v60 = vld [vmem:[%s8013_s7 + $0x500] ss:$16 sps:$4 sm:$0xff]   ;;  %v2907_v63 = vmax.f32 %v2856_v44, 0.0  ;;  %v2909_v15 = vmax.f32 %v2897_v1, 0.0  ;;  %v5810_v61 = vld [vmem:[%s8013_s7 + $0x2e8] ss:$16 sps:$4 sm:$0xff]  }
 0x34a   :  { %v2859_v7 = vpop.f32.mrf.mxu0  ;;  %v2900_v8 = vpop.f32.mrf.mxu1  ;;  %4573 = vmatprep.subr.bf16.mxu0 %v5755_v28  ;;  %4614 = vmatprep.subr.bf16.mxu1 %v5758_v46  ;;  %v5804_v62 = vld [vmem:[%s8013_s7 + $0x700] ss:$16 sps:$4 sm:$0xff]   ;;  %v5807_v28 = vld [vmem:[%s8013_s7 + $0xe8] ss:$16 sps:$4 sm:$0xff]   ;;  %v5869_v54 = vld [vmem:[%s8013_s7 + $0x1ac] ss:$16 sps:$4 sm:$0xff]  }
 0x34b   :  { %v2908_v11 = vmax.f32 %v2858_v3, 0.0  ;;  %v2910_v12 = vmax.f32 %v2899_v4, 0.0  ;;  %v7607_v46 = vpack.c.bf16 %v2907_v63, %v2907_v63  ;;  %v7609_v2 = vpack.c.bf16 %v2909_v15, %v2909_v15  ;;  %v5815_v3 = vld [vmem:[%s8013_s7 + $0xcc] ss:$16 sps:$4 sm:$0xff]   ;;  %v5819_v8 = vld [vmem:[%s8013_s7 + $0xa8] ss:$16 sps:$4 sm:$0xff]  }
 0x34c   :  { %v2860_v18 = vpop.f32.mrf.mxu0  ;;  %v2901_v19 = vpop.f32.mrf.mxu1  ;;  %v5818_v4 = vld [vmem:[%s8013_s7 + $0x2cc] ss:$16 sps:$4 sm:$0xff]   ;;  %v5873_v44 = vld [vmem:[%s8013_s7 + $0x188] ss:$16 sps:$4 sm:$0xff]  }
 0x34d   :  { %v7494_v20 = vpack.c.bf16 %v2908_v11, %v2908_v11  ;;  %v7496_v21 = vpack.c.bf16 %v2910_v12, %v2910_v12  ;;  %4574 = vmatpush1.bf16.msra.mxu0 %v5753_v5  ;;  %4615 = vmatpush1.bf16.msra.mxu1 %v5756_v6  ;;  %v5813_v5 = vld [vmem:[%s8013_s7 + $0xc8] ss:$16 sps:$4 sm:$0xff]   ;;  %v5821_v7 = vld [vmem:[%s8013_s7 + $0xac] ss:$16 sps:$4 sm:$0xff]  }
 0x34e   :  { %4575 = vmatprep.subr.bf16.mxu0 %v5761_v9  ;;  %4616 = vmatprep.subr.bf16.mxu1 %v5764_v10  ;;  %v5816_v6 = vld [vmem:[%s8013_s7 + $0x2c8] ss:$16 sps:$4 sm:$0xff]   ;;  %v5827_v9 = vld [vmem:[%s8013_s7 + $0x8c] ss:$16 sps:$4 sm:$0xff]  }
 0x34f   :  { %4591 = vmatprep.mubr.bf16.mxu0 %v7494_v20  ;;  %4632 = vmatprep.mubr.bf16.mxu1 %v7496_v21  ;;  %v5830_v10 = vld [vmem:[%s8013_s7 + $0x28c] ss:$16 sps:$4 sm:$0xff]   ;;  %v5825_v11 = vld [vmem:[%s8013_s7 + $0x88] ss:$16 sps:$4 sm:$0xff]  }
 0x350   :  { %v5828_v12 = vld [vmem:[%s8013_s7 + $0x288] ss:$16 sps:$4 sm:$0xff]   ;;  %v5833_v18 = vld [vmem:[%s8013_s7 + $0x6c] ss:$16 sps:$4 sm:$0xff]  }
 0x351   :  { %4576 = vmatpush2.bf16.msra.mxu0 %v5759_v22  ;;  %4617 = vmatpush2.bf16.msra.mxu1 %v5762_v24  ;;  %v5836_v19 = vld [vmem:[%s8013_s7 + $0x26c] ss:$16 sps:$4 sm:$0xff]   ;;  %v5831_v22 = vld [vmem:[%s8013_s7 + $0x68] ss:$16 sps:$4 sm:$0xff]  }
 0x352   :  { %4577 = vmatprep.subr.bf16.mxu0 %v5767_v25  ;;  %4618 = vmatprep.subr.bf16.mxu1 %v5770_v26  ;;  %v5834_v24 = vld [vmem:[%s8013_s7 + $0x268] ss:$16 sps:$4 sm:$0xff]   ;;  %v5839_v25 = vld [vmem:[%s8013_s7 + $0x4c] ss:$16 sps:$4 sm:$0xff]  }
 0x353   :  { %v5842_v26 = vld [vmem:[%s8013_s7 + $0x24c] ss:$16 sps:$4 sm:$0xff]   ;;  %v5876_v1 = vld [vmem:[%s8013_s7 + $0x388] ss:$16 sps:$4 sm:$0xff]  }
 0x354   :  { %v5872_v55 = vld [vmem:[%s8013_s7 + $0x3ac] ss:$16 sps:$4 sm:$0xff]  }
 0x355   :  { %4578 = vmatpush2.bf16.msra.mxu0 %v5765_v31  ;;  %4619 = vmatpush2.bf16.msra.mxu1 %v5768_v32  ;;  %v5837_v31 = vld [vmem:[%s8013_s7 + $0x48] ss:$16 sps:$4 sm:$0xff]   ;;  %v5887_v63 = vld [vmem:[%s8013_s7 + $0x14c] ss:$16 sps:$4 sm:$0xff]  }
 0x356   :  { %4579 = vmatprep.subr.bf16.mxu0 %v5773_v35  ;;  %4620 = vmatprep.subr.bf16.mxu1 %v5776_v36  ;;  %v5840_v32 = vld [vmem:[%s8013_s7 + $0x248] ss:$16 sps:$4 sm:$0xff]   ;;  %v5845_v35 = vld [vmem:[%s8013_s7 + $0x2c] ss:$16 sps:$4 sm:$0xff]  }
 0x357   :  { %v5848_v36 = vld [vmem:[%s8013_s7 + $0x22c] ss:$16 sps:$4 sm:$0xff]  }
 0x358   :  { %v5890_v15 = vld [vmem:[%s8013_s7 + $0x34c] ss:$16 sps:$4 sm:$0xff]  }
 0x359   :  { %4580 = vmatpush2.bf16.msra.mxu0 %v5771_v37  ;;  %4621 = vmatpush2.bf16.msra.mxu1 %v5774_v39  ;;  %v5843_v37 = vld [vmem:[%s8013_s7 + $0x28] ss:$16 sps:$4 sm:$0xff]  }
 0x35a   :  { %4581 = vmatprep.subr.bf16.mxu0 %v5779_v40  ;;  %4622 = vmatprep.subr.bf16.mxu1 %v5782_v41  ;;  %v5846_v39 = vld [vmem:[%s8013_s7 + $0x228] ss:$16 sps:$4 sm:$0xff]   ;;  %v5851_v40 = vld [vmem:[%s8013_s7 + $0xc] ss:$16 sps:$4 sm:$0xff]  }
 0x35b   :  { %v5854_v41 = vld [vmem:[%s8013_s7 + $0x20c] ss:$16 sps:$4 sm:$0xff]  }
 0x35d   :  { %4582 = vmatpush2.bf16.msra.mxu0 %v5777_v42  ;;  %4623 = vmatpush2.bf16.msra.mxu1 %v5780_v43  ;;  %v5849_v42 = vld [vmem:[%s8013_s7 + $0x8] ss:$16 sps:$4 sm:$0xff]  }
 0x35e   :  { %4583 = vmatprep.subr.bf16.mxu0 %v5785_v48  ;;  %4624 = vmatprep.subr.bf16.mxu1 %v5788_v49  ;;  %v5852_v43 = vld [vmem:[%s8013_s7 + $0x208] ss:$16 sps:$4 sm:$0xff]   ;;  %v5857_v48 = vld [vmem:[%s8013_s7 + $0x1ec] ss:$16 sps:$4 sm:$0xff]  }
 0x35f   :  { %v5860_v49 = vld [vmem:[%s8013_s7 + $0x3ec] ss:$16 sps:$4 sm:$0xff]  }
 0x361   :  { %4584 = vmatpush2.bf16.msra.mxu0 %v5783_v50  ;;  %4625 = vmatpush2.bf16.msra.mxu1 %v5786_v23  ;;  %v5855_v50 = vld [vmem:[%s8013_s7 + $0x1e8] ss:$16 sps:$4 sm:$0xff]  }
 0x362   :  { %4585 = vmatprep.subr.bf16.mxu0 %v5791_v51  ;;  %4626 = vmatprep.subr.bf16.mxu1 %v5794_v17  ;;  %v5858_v23 = vld [vmem:[%s8013_s7 + $0x3e8] ss:$16 sps:$4 sm:$0xff]   ;;  %v5863_v51 = vld [vmem:[%s8013_s7 + $0x1cc] ss:$16 sps:$4 sm:$0xff]  }
 0x363   :  { %v5866_v17 = vld [vmem:[%s8013_s7 + $0x3cc] ss:$16 sps:$4 sm:$0xff]  }
 0x365   :  { %4586 = vmatpush2.bf16.msra.mxu0 %v5789_v52  ;;  %4627 = vmatpush2.bf16.msra.mxu1 %v5792_v53  ;;  %v5861_v52 = vld [vmem:[%s8013_s7 + $0x1c8] ss:$16 sps:$4 sm:$0xff]  }
 0x366   :  { %4587 = vmatprep.subr.bf16.mxu0 %v5797_v56  ;;  %4628 = vmatprep.subr.bf16.mxu1 %v5800_v57  ;;  %v5864_v53 = vld [vmem:[%s8013_s7 + $0x3c8] ss:$16 sps:$4 sm:$0xff]  }
 0x367   :  { %v5867_v56 = vld [vmem:[%s8013_s7 + $0x1a8] ss:$16 sps:$4 sm:$0xff]  }
 0x368   :  { %v5870_v57 = vld [vmem:[%s8013_s7 + $0x3a8] ss:$16 sps:$4 sm:$0xff]  }
 0x369   :  { %4588 = vmatpush2.bf16.msra.mxu0 %v5795_v27  ;;  %4629 = vmatpush2.bf16.msra.mxu1 %v5798_v13  ;;  %v5875_v27 = vld [vmem:[%s8013_s7 + $0x18c] ss:$16 sps:$4 sm:$0xff]  }
 0x36a   :  { %4589 = vmatprep.subr.bf16.mxu0 %v5803_v58  ;;  %4630 = vmatprep.subr.bf16.mxu1 %v5806_v59  ;;  %v5878_v13 = vld [vmem:[%s8013_s7 + $0x38c] ss:$16 sps:$4 sm:$0xff]  }
 0x36b   :  { %v5881_v58 = vld [vmem:[%s8013_s7 + $0x16c] ss:$16 sps:$4 sm:$0xff]  }
 0x36c   :  { %v5884_v59 = vld [vmem:[%s8013_s7 + $0x36c] ss:$16 sps:$4 sm:$0xff]  }
 0x36d   :  { %4590 = vmatpush2.bf16.msra.mxu0 %v5801_v60  ;;  %4631 = vmatpush2.bf16.msra.mxu1 %v5804_v62  ;;  %v5879_v60 = vld [vmem:[%s8013_s7 + $0x168] ss:$16 sps:$4 sm:$0xff]  }
 0x36e   :  { %4641 = vmatprep.subr.bf16.mxu0 %v5809_v38  ;;  %4682 = vmatprep.subr.bf16.mxu1 %v5812_v0  ;;  %v5882_v62 = vld [vmem:[%s8013_s7 + $0x368] ss:$16 sps:$4 sm:$0xff]  }
 0x36f   :  { %v5885_v38 = vld [vmem:[%s8013_s7 + $0x148] ss:$16 sps:$4 sm:$0xff]  }
 0x370   :  { %4592 = vmatmul.mubr.bf16.vlgmr.msra.gmra.mxu0 %v7607_v46  ;;  %4633 = vmatmul.mubr.bf16.vlgmr.msra.gmra.mxu1 %v7609_v2  ;;  %v5888_v0 = vld [vmem:[%s8013_s7 + $0x348] ss:$16 sps:$4 sm:$0xff]  }
 0x371   :  { %4642 = vmatpush1.bf16.msra.mxu0 %v5807_v28  ;;  %4673 = vmatprep.mubr.bf16.mxu0 %v7376_v29  ;;  %v5824_v29 = vld [vmem:[%s8013_s7 + $0x2ac] ss:$16 sps:$4 sm:$0xff]  }
 0x372   :  { %4683 = vmatpush1.bf16.msra.mxu1 %v5810_v61  ;;  %4714 = vmatprep.mubr.bf16.mxu1 %v7378_v30  ;;  %v5822_v30 = vld [vmem:[%s8013_s7 + $0x2a8] ss:$16 sps:$4 sm:$0xff]   ;;  %v5893_v28 = vld [vmem:[%s8013_s7 + $0x12c] ss:$16 sps:$4 sm:$0xff]  }
 0x373   :  { %4643 = vmatprep.subr.bf16.mxu0 %v5815_v3  ;;  %4684 = vmatprep.subr.bf16.mxu1 %v5818_v4  ;;  %v5896_v61 = vld [vmem:[%s8013_s7 + $0x32c] ss:$16 sps:$4 sm:$0xff]   ;;  %v5891_v3 = vld [vmem:[%s8013_s7 + $0x128] ss:$16 sps:$4 sm:$0xff]  }
 0x374   :  { %v5894_v4 = vld [vmem:[%s8013_s7 + $0x328] ss:$16 sps:$4 sm:$0xff]  }
 0x375   :  { %4644 = vmatpush1.bf16.msra.mxu0 %v5813_v5  ;;  %v5899_v5 = vld [vmem:[%s8013_s7 + $0x10c] ss:$16 sps:$4 sm:$0xff]  }
 0x376   :  { %4685 = vmatpush1.bf16.msra.mxu1 %v5816_v6  ;;  %4645 = vmatprep.subr.bf16.mxu0 %v5821_v7  ;;  %v5902_v6 = vld [vmem:[%s8013_s7 + $0x30c] ss:$16 sps:$4 sm:$0xff]   ;;  %v5897_v7 = vld [vmem:[%s8013_s7 + $0x108] ss:$16 sps:$4 sm:$0xff]  }
 0x377   :  { %4686 = vmatprep.subr.bf16.mxu1 %v5824_v29  ;;  %v5900_v29 = vld [vmem:[%s8013_s7 + $0x308] ss:$16 sps:$4 sm:$0xff]  }
 0x379   :  { %4646 = vmatpush1.bf16.msra.mxu0 %v5819_v8  ;;  %v5905_v8 = vld [vmem:[%s8013_s7 + $0x4ec] ss:$16 sps:$4 sm:$0xff]  }
 0x37a   :  { %4687 = vmatpush1.bf16.msra.mxu1 %v5822_v30  ;;  %4647 = vmatprep.subr.bf16.mxu0 %v5827_v9  ;;  %v5908_v30 = vld [vmem:[%s8013_s7 + $0x6ec] ss:$16 sps:$4 sm:$0xff]   ;;  %v5903_v9 = vld [vmem:[%s8013_s7 + $0x4e8] ss:$16 sps:$4 sm:$0xff]  }
 0x37b   :  { %4688 = vmatprep.subr.bf16.mxu1 %v5830_v10  ;;  %v5906_v10 = vld [vmem:[%s8013_s7 + $0x6e8] ss:$16 sps:$4 sm:$0xff]  }
 0x37d   :  { %4648 = vmatpush1.bf16.msra.mxu0 %v5825_v11  ;;  %v5911_v11 = vld [vmem:[%s8013_s7 + $0x4cc] ss:$16 sps:$4 sm:$0xff]  }
 0x37e   :  { %4689 = vmatpush1.bf16.msra.mxu1 %v5828_v12  ;;  %4649 = vmatprep.subr.bf16.mxu0 %v5833_v18  ;;  %v5914_v12 = vld [vmem:[%s8013_s7 + $0x6cc] ss:$16 sps:$4 sm:$0xff]   ;;  %v5909_v18 = vld [vmem:[%s8013_s7 + $0x4c8] ss:$16 sps:$4 sm:$0xff]  }
 0x37f   :  { %4690 = vmatprep.subr.bf16.mxu1 %v5836_v19  ;;  %v5912_v19 = vld [vmem:[%s8013_s7 + $0x6c8] ss:$16 sps:$4 sm:$0xff]  }
 0x381   :  { %4650 = vmatpush1.bf16.msra.mxu0 %v5831_v22  ;;  %v5918_v22 = vld [vmem:[%s8013_s7 + $0x6a8] ss:$16 sps:$4 sm:$0xff]  }
 0x382   :  { %4691 = vmatpush1.bf16.msra.mxu1 %v5834_v24  ;;  %4651 = vmatprep.subr.bf16.mxu0 %v5839_v25  ;;  %v5926_v24 = vld [vmem:[%s8013_s7 + $0x68c] ss:$16 sps:$4 sm:$0xff]   ;;  %v5921_v25 = vld [vmem:[%s8013_s7 + $0x488] ss:$16 sps:$4 sm:$0xff]  }
 0x383   :  { %4692 = vmatprep.subr.bf16.mxu1 %v5842_v26  ;;  %v5924_v26 = vld [vmem:[%s8013_s7 + $0x688] ss:$16 sps:$4 sm:$0xff]  }
 0x385   :  { %4652 = vmatpush1.bf16.msra.mxu0 %v5837_v31  ;;  %v5929_v31 = vld [vmem:[%s8013_s7 + $0x46c] ss:$16 sps:$4 sm:$0xff]  }
 0x386   :  { %4693 = vmatpush1.bf16.msra.mxu1 %v5840_v32  ;;  %4653 = vmatprep.subr.bf16.mxu0 %v5845_v35  ;;  %v5932_v32 = vld [vmem:[%s8013_s7 + $0x66c] ss:$16 sps:$4 sm:$0xff]   ;;  %v5927_v35 = vld [vmem:[%s8013_s7 + $0x468] ss:$16 sps:$4 sm:$0xff]  }
 0x387   :  { %4694 = vmatprep.subr.bf16.mxu1 %v5848_v36  ;;  %v5930_v36 = vld [vmem:[%s8013_s7 + $0x668] ss:$16 sps:$4 sm:$0xff]  }
 0x389   :  { %4654 = vmatpush1.bf16.msra.mxu0 %v5843_v37  ;;  %v5935_v37 = vld [vmem:[%s8013_s7 + $0x44c] ss:$16 sps:$4 sm:$0xff]  }
 0x38a   :  { %4695 = vmatpush1.bf16.msra.mxu1 %v5846_v39  ;;  %4655 = vmatprep.subr.bf16.mxu0 %v5851_v40  ;;  %v5938_v39 = vld [vmem:[%s8013_s7 + $0x64c] ss:$16 sps:$4 sm:$0xff]   ;;  %v5933_v40 = vld [vmem:[%s8013_s7 + $0x448] ss:$16 sps:$4 sm:$0xff]  }
 0x38b   :  { %4696 = vmatprep.subr.bf16.mxu1 %v5854_v41  ;;  %v5936_v41 = vld [vmem:[%s8013_s7 + $0x648] ss:$16 sps:$4 sm:$0xff]  }
 0x38d   :  { %4656 = vmatpush1.bf16.msra.mxu0 %v5849_v42  ;;  %v5941_v42 = vld [vmem:[%s8013_s7 + $0x42c] ss:$16 sps:$4 sm:$0xff]  }
 0x38e   :  { %4697 = vmatpush1.bf16.msra.mxu1 %v5852_v43  ;;  %4657 = vmatprep.subr.bf16.mxu0 %v5857_v48  ;;  %v5944_v43 = vld [vmem:[%s8013_s7 + $0x62c] ss:$16 sps:$4 sm:$0xff]   ;;  %v5939_v48 = vld [vmem:[%s8013_s7 + $0x428] ss:$16 sps:$4 sm:$0xff]  }
 0x38f   :  { %4698 = vmatprep.subr.bf16.mxu1 %v5860_v49  ;;  %v5942_v49 = vld [vmem:[%s8013_s7 + $0x628] ss:$16 sps:$4 sm:$0xff]  }
 0x391   :  { %4658 = vmatpush2.bf16.msra.mxu0 %v5855_v50  ;;  %v5947_v50 = vld [vmem:[%s8013_s7 + $0x40c] ss:$16 sps:$4 sm:$0xff]  }
 0x392   :  { %4699 = vmatpush2.bf16.msra.mxu1 %v5858_v23  ;;  %4659 = vmatprep.subr.bf16.mxu0 %v5863_v51  ;;  %v5950_v23 = vld [vmem:[%s8013_s7 + $0x60c] ss:$16 sps:$4 sm:$0xff]   ;;  %v5945_v51 = vld [vmem:[%s8013_s7 + $0x408] ss:$16 sps:$4 sm:$0xff]  }
 0x393   :  { %4700 = vmatprep.subr.bf16.mxu1 %v5866_v17  ;;  %v5948_v17 = vld [vmem:[%s8013_s7 + $0x608] ss:$16 sps:$4 sm:$0xff]  }
 0x395   :  { %4660 = vmatpush2.bf16.msra.mxu0 %v5861_v52  ;;  %v5953_v52 = vld [vmem:[%s8013_s7 + $0x5ec] ss:$16 sps:$4 sm:$0xff]  }
 0x396   :  { %4701 = vmatpush2.bf16.msra.mxu1 %v5864_v53  ;;  %4661 = vmatprep.subr.bf16.mxu0 %v5869_v54  ;;  %v5956_v53 = vld [vmem:[%s8013_s7 + $0x7ec] ss:$16 sps:$4 sm:$0xff]   ;;  %v5951_v54 = vld [vmem:[%s8013_s7 + $0x5e8] ss:$16 sps:$4 sm:$0xff]  }
 0x397   :  { %4702 = vmatprep.subr.bf16.mxu1 %v5872_v55  ;;  %v5954_v55 = vld [vmem:[%s8013_s7 + $0x7e8] ss:$16 sps:$4 sm:$0xff]  }
 0x399   :  { %4662 = vmatpush2.bf16.msra.mxu0 %v5867_v56  ;;  %v5959_v56 = vld [vmem:[%s8013_s7 + $0x5cc] ss:$16 sps:$4 sm:$0xff]  }
 0x39a   :  { %4703 = vmatpush2.bf16.msra.mxu1 %v5870_v57  ;;  %4663 = vmatprep.subr.bf16.mxu0 %v5875_v27  ;;  %v5962_v57 = vld [vmem:[%s8013_s7 + $0x7cc] ss:$16 sps:$4 sm:$0xff]   ;;  %v5957_v27 = vld [vmem:[%s8013_s7 + $0x5c8] ss:$16 sps:$4 sm:$0xff]  }
 0x39b   :  { %4704 = vmatprep.subr.bf16.mxu1 %v5878_v13  ;;  %v5960_v13 = vld [vmem:[%s8013_s7 + $0x7c8] ss:$16 sps:$4 sm:$0xff]  }
 0x39d   :  { %4664 = vmatpush2.bf16.msra.mxu0 %v5873_v44  ;;  %v5965_v44 = vld [vmem:[%s8013_s7 + $0x5ac] ss:$16 sps:$4 sm:$0xff]  }
 0x39e   :  { %4705 = vmatpush2.bf16.msra.mxu1 %v5876_v1  ;;  %4665 = vmatprep.subr.bf16.mxu0 %v5881_v58  ;;  %v5968_v1 = vld [vmem:[%s8013_s7 + $0x7ac] ss:$16 sps:$4 sm:$0xff]   ;;  %v5963_v58 = vld [vmem:[%s8013_s7 + $0x5a8] ss:$16 sps:$4 sm:$0xff]  }
 0x39f   :  { %4706 = vmatprep.subr.bf16.mxu1 %v5884_v59  ;;  %v5966_v59 = vld [vmem:[%s8013_s7 + $0x7a8] ss:$16 sps:$4 sm:$0xff]  }
 0x3a1   :  { %4666 = vmatpush2.bf16.msra.mxu0 %v5879_v60  ;;  %v5971_v60 = vld [vmem:[%s8013_s7 + $0x58c] ss:$16 sps:$4 sm:$0xff]  }
 0x3a2   :  { %4707 = vmatpush2.bf16.msra.mxu1 %v5882_v62  ;;  %4667 = vmatprep.subr.bf16.mxu0 %v5887_v63  ;;  %v5974_v62 = vld [vmem:[%s8013_s7 + $0x78c] ss:$16 sps:$4 sm:$0xff]   ;;  %v5969_v63 = vld [vmem:[%s8013_s7 + $0x588] ss:$16 sps:$4 sm:$0xff]  }
 0x3a3   :  { %4708 = vmatprep.subr.bf16.mxu1 %v5890_v15  ;;  %v5972_v15 = vld [vmem:[%s8013_s7 + $0x788] ss:$16 sps:$4 sm:$0xff]  }
 0x3a5   :  { %4668 = vmatpush2.bf16.msra.mxu0 %v5885_v38  ;;  %v5977_v38 = vld [vmem:[%s8013_s7 + $0x56c] ss:$16 sps:$4 sm:$0xff]  }
 0x3a6   :  { %4709 = vmatpush2.bf16.msra.mxu1 %v5888_v0  ;;  %4669 = vmatprep.subr.bf16.mxu0 %v5893_v28  ;;  %v5980_v0 = vld [vmem:[%s8013_s7 + $0x76c] ss:$16 sps:$4 sm:$0xff]   ;;  %v5975_v28 = vld [vmem:[%s8013_s7 + $0x568] ss:$16 sps:$4 sm:$0xff]  }
 0x3a7   :  { %4710 = vmatprep.subr.bf16.mxu1 %v5896_v61  ;;  %v5978_v61 = vld [vmem:[%s8013_s7 + $0x768] ss:$16 sps:$4 sm:$0xff]  }
 0x3a9   :  { %4670 = vmatpush2.bf16.msra.mxu0 %v5891_v3  ;;  %v5983_v3 = vld [vmem:[%s8013_s7 + $0x54c] ss:$16 sps:$4 sm:$0xff]  }
 0x3aa   :  { %4711 = vmatpush2.bf16.msra.mxu1 %v5894_v4  ;;  %4671 = vmatprep.subr.bf16.mxu0 %v5899_v5  ;;  %v5986_v4 = vld [vmem:[%s8013_s7 + $0x74c] ss:$16 sps:$4 sm:$0xff]   ;;  %v5981_v5 = vld [vmem:[%s8013_s7 + $0x548] ss:$16 sps:$4 sm:$0xff]  }
 0x3ab   :  { %4712 = vmatprep.subr.bf16.mxu1 %v5902_v6  ;;  %v5984_v6 = vld [vmem:[%s8013_s7 + $0x748] ss:$16 sps:$4 sm:$0xff]  }
 0x3ad   :  { %4672 = vmatpush2.bf16.msra.mxu0 %v5897_v7  ;;  %v5989_v7 = vld [vmem:[%s8013_s7 + $0x52c] ss:$16 sps:$4 sm:$0xff]  }
 0x3ae   :  { %4713 = vmatpush2.bf16.msra.mxu1 %v5900_v29  ;;  %4723 = vmatprep.subr.bf16.mxu0 %v5905_v8  ;;  %v5992_v29 = vld [vmem:[%s8013_s7 + $0x72c] ss:$16 sps:$4 sm:$0xff]   ;;  %v5987_v8 = vld [vmem:[%s8013_s7 + $0x528] ss:$16 sps:$4 sm:$0xff]  }
 0x3af   :  { %4764 = vmatprep.subr.bf16.mxu1 %v5908_v30  ;;  %v5990_v30 = vld [vmem:[%s8013_s7 + $0x728] ss:$16 sps:$4 sm:$0xff]  }
 0x3b0   :  { %4674 = vmatmul.mubr.bf16.vlgmr.msra.gmra.mxu0 %v7386_v33  ;;  %v5917_v33 = vld [vmem:[%s8013_s7 + $0x4ac] ss:$16 sps:$4 sm:$0xff]  }
 0x3b1   :  { %4715 = vmatmul.mubr.bf16.vlgmr.msra.gmra.mxu1 %v7388_v34  ;;  %4724 = vmatpush1.bf16.msra.mxu0 %v5903_v9  ;;  %v5920_v34 = vld [vmem:[%s8013_s7 + $0x6ac] ss:$16 sps:$4 sm:$0xff]  }
 0x3b2   :  { %4755 = vmatprep.mubr.bf16.mxu0 %v7494_v20  ;;  %4765 = vmatpush1.bf16.msra.mxu1 %v5906_v10  ;;  %v5915_v20 = vld [vmem:[%s8013_s7 + $0x4a8] ss:$16 sps:$4 sm:$0xff]   ;;  %v5995_v9 = vld [vmem:[%s8013_s7 + $0x50c] ss:$16 sps:$4 sm:$0xff]  }
 0x3b3   :  { %4796 = vmatprep.mubr.bf16.mxu1 %v7496_v21  ;;  %4725 = vmatprep.subr.bf16.mxu0 %v5911_v11  ;;  %v5923_v21 = vld [vmem:[%s8013_s7 + $0x48c] ss:$16 sps:$4 sm:$0xff]   ;;  %v5993_v11 = vld [vmem:[%s8013_s7 + $0x508] ss:$16 sps:$4 sm:$0xff]  }
 0x3b4   :  { %4766 = vmatprep.subr.bf16.mxu1 %v5914_v12  ;;  %v5998_v10 = vld [vmem:[%s8013_s7 + $0x70c] ss:$16 sps:$4 sm:$0xff]   ;;  %v5996_v12 = vld [vmem:[%s8013_s7 + $0x708] ss:$16 sps:$4 sm:$0xff]   ;;  %s6038_s7 = smov [#allocation2]  }
 0x3b5   :  { %4726 = vmatpush1.bf16.msra.mxu0 %v5909_v18 }
 0x3b6   :  { %4767 = vmatpush1.bf16.msra.mxu1 %v5912_v19  ;;  %4727 = vmatprep.subr.bf16.mxu0 %v5917_v33 }
 0x3b7   :  { %4768 = vmatprep.subr.bf16.mxu1 %v5920_v34 }
 0x3b9   :  { %4728 = vmatpush1.bf16.msra.mxu0 %v5915_v20 }
 0x3ba   :  { %4769 = vmatpush1.bf16.msra.mxu1 %v5918_v22  ;;  %4729 = vmatprep.subr.bf16.mxu0 %v5923_v21 }
 0x3bb   :  { %4770 = vmatprep.subr.bf16.mxu1 %v5926_v24 }
 0x3bd   :  { %4730 = vmatpush1.bf16.msra.mxu0 %v5921_v25  ;;  %v3175_v25 = vld [vmem:[%s8014_s8] sm:$0xf]  ;;  %s4856_s8 = sshll.u32 %s6038_s7, 4  ;;  %s4857_s8 = int_to_ptr.vmem [resolvable:$true] %s4856_s8 }
 0x3be   :  { %4771 = vmatpush1.bf16.msra.mxu1 %v5924_v26  ;;  %4731 = vmatprep.subr.bf16.mxu0 %v5929_v31  ;;  %v3180_v26 = vrot.slane %v3175_v25, %v6834_v14  ;;  %v3184_v31 = vrot.slane %v3175_v25, %v6842_v16  ;;  %s6015_s1 = scalar_lea.vmem %s4857_s8, 256  ;;  %p6020_p1 = scmp.lt.s32.totalorder %s4857_s8, %s4857_s8 }
 0x3bf   :  { %4772 = vmatprep.subr.bf16.mxu1 %v5932_v32  ;;  %p6016_p0 = scmp.ne.s32.totalorder %s4857_s8, %s6015_s1  ;;  %p6021_p2 = scmp.lt.s32.totalorder %s6015_s1, %s6015_s1 }
 0x3c1   :  { %4732 = vmatpush1.bf16.msra.mxu0 %v5927_v35  ;;  %p6022_p3 = por %p6021_p2, %p6020_p1 }
 0x3c2   :  { %4773 = vmatpush1.bf16.msra.mxu1 %v5930_v36  ;;  %4733 = vmatprep.subr.bf16.mxu0 %v5935_v37 }
 0x3c3   :  { %4774 = vmatprep.subr.bf16.mxu1 %v5938_v39  ;;  %p6023_p4 = pnand %p6022_p3, %p6016_p0 }
 0x3c5   :  { %4734 = vmatpush1.bf16.msra.mxu0 %v5933_v40 }
 0x3c6   :  { %4775 = vmatpush1.bf16.msra.mxu1 %v5936_v41  ;;  %4735 = vmatprep.subr.bf16.mxu0 %v5941_v42 }
 0x3c7   :  { %4776 = vmatprep.subr.bf16.mxu1 %v5944_v43 }
 0x3c9   :  { %4736 = vmatpush1.bf16.msra.mxu0 %v5939_v48 }
 0x3ca   :  { %4777 = vmatpush1.bf16.msra.mxu1 %v5942_v49  ;;  %4737 = vmatprep.subr.bf16.mxu0 %v5947_v50 }
 0x3cb   :  { %4778 = vmatprep.subr.bf16.mxu1 %v5950_v23 }
 0x3cd   :  { %4738 = vmatpush1.bf16.msra.mxu0 %v5945_v51 }
 0x3ce   :  { %4779 = vmatpush1.bf16.msra.mxu1 %v5948_v17  ;;  %4739 = vmatprep.subr.bf16.mxu0 %v5953_v52 }
 0x3cf   :  { %4780 = vmatprep.subr.bf16.mxu1 %v5956_v53 }
 0x3d1   :  { %4740 = vmatpush2.bf16.msra.mxu0 %v5951_v54 }
 0x3d2   :  { %4781 = vmatpush2.bf16.msra.mxu1 %v5954_v55  ;;  %4741 = vmatprep.subr.bf16.mxu0 %v5959_v56 }
 0x3d3   :  { %4782 = vmatprep.subr.bf16.mxu1 %v5962_v57 }
 0x3d5   :  { %4742 = vmatpush2.bf16.msra.mxu0 %v5957_v27 }
 0x3d6   :  { %4783 = vmatpush2.bf16.msra.mxu1 %v5960_v13  ;;  %4743 = vmatprep.subr.bf16.mxu0 %v5965_v44 }
 0x3d7   :  { %4784 = vmatprep.subr.bf16.mxu1 %v5968_v1 }
 0x3d9   :  { %4744 = vmatpush2.bf16.msra.mxu0 %v5963_v58 }
 0x3da   :  { %4785 = vmatpush2.bf16.msra.mxu1 %v5966_v59  ;;  %4745 = vmatprep.subr.bf16.mxu0 %v5971_v60 }
 0x3db   :  { %4786 = vmatprep.subr.bf16.mxu1 %v5974_v62 }
 0x3dd   :  { %4746 = vmatpush2.bf16.msra.mxu0 %v5969_v63  ;;  %v3188_v63 = vrot.slane %v3175_v25, %v6882_v45 }
 0x3de   :  { %4787 = vmatpush2.bf16.msra.mxu1 %v5972_v15  ;;  %4747 = vmatprep.subr.bf16.mxu0 %v5977_v38  ;;  %v3192_v15 = vrot.slane %v3175_v25, %v6888_v47 }
 0x3df   :  { %4788 = vmatprep.subr.bf16.mxu1 %v5980_v0 }
 0x3e1   :  { %4748 = vmatpush2.bf16.msra.mxu0 %v5975_v28 }
 0x3e2   :  { %4789 = vmatpush2.bf16.msra.mxu1 %v5978_v61  ;;  %4749 = vmatprep.subr.bf16.mxu0 %v5983_v3 }
 0x3e3   :  { %4790 = vmatprep.subr.bf16.mxu1 %v5986_v4 }
 0x3e5   :  { %4750 = vmatpush2.bf16.msra.mxu0 %v5981_v5 }
 0x3e6   :  { %4791 = vmatpush2.bf16.msra.mxu1 %v5984_v6  ;;  %4751 = vmatprep.subr.bf16.mxu0 %v5989_v7 }
 0x3e7   :  { %4792 = vmatprep.subr.bf16.mxu1 %v5992_v29 }
 0x3e9   :  { %4752 = vmatpush2.bf16.msra.mxu0 %v5987_v8 }
 0x3ea   :  { %4793 = vmatpush2.bf16.msra.mxu1 %v5990_v30  ;;  %4753 = vmatprep.subr.bf16.mxu0 %v5995_v9 }
 0x3eb   :  { %4794 = vmatprep.subr.bf16.mxu1 %v5998_v10 }
 0x3ed   :  { %4754 = vmatpush2.bf16.msra.mxu0 %v5993_v11 }
 0x3ee   :  { %4795 = vmatpush2.bf16.msra.mxu1 %v5996_v12 }
 0x3f0   :  { %4756 = vmatmul.mubr.bf16.vlgmr.msra.gmra.mxu0 %v7607_v46  ;;  %v4511_v18 = vpop.f32.mrf.mxu0  ;;  %v4552_v19 = vpop.f32.mrf.mxu1 }
 0x3f1   :  { %4797 = vmatmul.mubr.bf16.vlgmr.msra.gmra.mxu1 %v7609_v2  ;;  %v4512_v32 = vadd.f32 %v4511_v18, %v3180_v26 }
 0x3f2   :  { %v4513_v33 = vpop.f32.mrf.mxu0  ;;  %v4554_v34 = vpop.f32.mrf.mxu1 }
 0x3f3   :  { %v4514_v46 = vadd.f32 %v4513_v33, %v3184_v31  ;;  %v4553_v35 = vadd.f32 %v4552_v19, %v4512_v32 }
 0x3f4   :  { %v4515_v20 = vpop.f32.mrf.mxu0  ;;  %v4556_v22 = vpop.f32.mrf.mxu1 }
 0x3f5   :  { %v4555_v2 = vadd.f32 %v4554_v34, %v4514_v46 }
 0x3f6   :  { %v4516_v21 = vpop.f32.mrf.mxu0  ;;  %v4557_v24 = vpop.f32.mrf.mxu1 }
 0x430   :  { %v4593_v36 = vpop.f32.mrf.mxu0  ;;  %v4634_v37 = vpop.f32.mrf.mxu1 }
 0x431   :  { %v4594_v39 = vadd.f32 %v4593_v36, %v4553_v35 }
 0x432   :  { %v4595_v40 = vpop.f32.mrf.mxu0  ;;  %v4636_v41 = vpop.f32.mrf.mxu1 }
 0x433   :  { %v4635_v42 = vadd.f32 %v4634_v37, %v4594_v39  ;;  %v4596_v43 = vadd.f32 %v4595_v40, %v4555_v2 }
 0x434   :  { %v4597_v48 = vpop.f32.mrf.mxu0  ;;  %v4638_v49 = vpop.f32.mrf.mxu1 }
 0x435   :  { %v5453_v50 = vmul.f32 -1.442695, %v4635_v42  ;;  %v4637_v23 = vadd.f32 %v4636_v41, %v4596_v43 }
 0x436   :  { %v4598_v51 = vpop.f32.mrf.mxu0  ;;  %v4639_v17 = vpop.f32.mrf.mxu1 }
 0x437   :  { %5999 = vpow2.f32 %v5453_v50  ;;  %v5454_v14 = vmul.f32 -1.442695, %v4637_v23 }
 0x439   :  { %6001 = vpow2.f32 %v5454_v14 }
 0x444   :  { %v6000_v16 = vpop.eup %5999 }
 0x445   :  { %v4817_v52 = vadd.f32 1.0, %v6000_v16 }
 0x446   :  { %v6002_v53 = vpop.eup %6001 }
 0x447   :  { %v4818_v54 = vadd.f32 1.0, %v6002_v53  ;;  %6003 = vrcp.f32 %v4817_v52 }
 0x449   :  { %6005 = vrcp.f32 %v4818_v54 }
 0x454   :  { %v6004_v55 = vpop.eup %6003 }
 0x456   :  { %v6006_v56 = vpop.eup %6005 }
 0x457   :  { %v5459_v57 = vpack.c.bf16 %v6006_v56, %v6004_v55 }
 0x459   :  { %4845 = vst [vmem:[#allocation2] sm:$0xff] %v5459_v57 }
 0x470   :  { %v4675_v27 = vpop.f32.mrf.mxu0 }
 0x471   :  { %v4716_v13 = vpop.f32.mrf.mxu1  ;;  %v4676_v38 = vadd.f32 %v4675_v27, %v3188_v63 }
 0x472   :  { %v4677_v44 = vpop.f32.mrf.mxu0 }
 0x473   :  { %v4718_v1 = vpop.f32.mrf.mxu1  ;;  %v4678_v0 = vadd.f32 %v4677_v44, %v3192_v15  ;;  %v4717_v28 = vadd.f32 %v4716_v13, %v4676_v38 }
 0x474   :  { %v4679_v58 = vpop.f32.mrf.mxu0 }
 0x475   :  { %v4720_v59 = vpop.f32.mrf.mxu1  ;;  %v4719_v3 = vadd.f32 %v4718_v1, %v4678_v0 }
 0x476   :  { %v4680_v60 = vpop.f32.mrf.mxu0 }
 0x477   :  { %v4721_v62 = vpop.f32.mrf.mxu1 }
 0x4b0   :  { %v4757_v61 = vpop.f32.mrf.mxu0 }
 0x4b1   :  { %v4758_v4 = vadd.f32 %v4757_v61, %v4717_v28  ;;  %v4798_v5 = vpop.f32.mrf.mxu1 }
 0x4b2   :  { %v4759_v6 = vpop.f32.mrf.mxu0 }
 0x4b3   :  { %v4799_v7 = vadd.f32 %v4798_v5, %v4758_v4  ;;  %v4760_v29 = vadd.f32 %v4759_v6, %v4719_v3  ;;  %v4800_v8 = vpop.f32.mrf.mxu1 }
 0x4b4   :  { %v4761_v30 = vpop.f32.mrf.mxu0 }
 0x4b5   :  { %v5455_v9 = vmul.f32 -1.442695, %v4799_v7  ;;  %v4801_v10 = vadd.f32 %v4800_v8, %v4760_v29  ;;  %v4802_v11 = vpop.f32.mrf.mxu1 }
 0x4b6   :  { %v4762_v12 = vpop.f32.mrf.mxu0 }
 0x4b7   :  { %6007 = vpow2.f32 %v5455_v9  ;;  %v5456_v45 = vmul.f32 -1.442695, %v4801_v10  ;;  %v4803_v18 = vpop.f32.mrf.mxu1 }
 0x4b9   :  { %6009 = vpow2.f32 %v5456_v45 }
 0x4c4   :  { %v6008_v47 = vpop.eup %6007 }
 0x4c5   :  { %v4819_v19 = vadd.f32 1.0, %v6008_v47 }
 0x4c6   :  { %v6010_v33 = vpop.eup %6009 }
 0x4c7   :  { %v4820_v34 = vadd.f32 1.0, %v6010_v33  ;;  %6011 = vrcp.f32 %v4819_v19 }
 0x4c9   :  { %6013 = vrcp.f32 %v4820_v34 }
 0x4d4   :  { %v6012_v20 = vpop.eup %6011 }
 0x4d6   :  { %v6014_v22 = vpop.eup %6013 }
 0x4d7   :  { %v5460_v21 = vpack.c.bf16 %v6014_v22, %v6012_v20 }
 0x4d9   :  { %4849 = vst.msk [vmem:[#allocation2 + $0x8] sm:$0xff] %vm4848_vm3, %v5460_v21 }
 0x4da   :  { %6026 = shalt.err (!%p6023_p4)
}
 0x4db   :  { %4859 = dma.vmem_to_hbm [thread:$0]  %s4857_s8, 256, %s8015_s9, [#allocation3]  }
 0x4dc   :  { %6035 = dma.done.wait [#allocation3], 256  }
 0x4dd   :  { %6036 = vsyncadd [#allocation3], 4294967040 }
 0x4de   :  { %4863 = vsyncpa [#allocation3], 1 }

</bundles_post_ra>
